<compile_context>
chip_gen: v6e
topology: v6e:2x2x1
jax: 0.10.0
libtpu: 0.0.40
codegen_flags: <defaults>
</compile_context>

<pallas_src>
import jax
import jax.numpy as jnp
import numpy as np
from jax.experimental import pallas as pl
from jax.experimental.pallas import tpu as pltpu


# ----------------------------------------------------------------------------------
# Kernel
# ----------------------------------------------------------------------------------
def _cmaff_kernel(d_att_ref, rgb_ref, ir_ref,
                  w1c_ref, b1c_ref, w2c_ref, b2c_ref,   # common-selective fc1/fc2
                  wf_ref, bf_ref,                        # fusion 1x1 conv (2C, C) + bias
                  out_ref):
    rgb = rgb_ref[0]                                    # (TM, C)  activation dtype
    ir = ir_ref[0]                                      # (TM, C)
    dt = rgb.dtype

    diff = (rgb - ir) * 0.5                             # (TM, C)
    common = (rgb + ir) * 0.5                           # (TM, C)

    # ---- Differential branch: attention precomputed outside (global pooling) ----
    gain = (1.0 + d_att_ref[0]).astype(dt)              # (1, C)
    enhanced = diff * gain                              # (TM, C)

    # ---- Common-selective branch: per-pixel channel softmax attention ----
    h = jnp.dot(common, w1c_ref[...], preferred_element_type=jnp.float32) + b1c_ref[...]
    h = jnp.maximum(h, 0.0).astype(dt)                  # (TM, Cr)
    logits = (jnp.dot(h, w2c_ref[...], preferred_element_type=jnp.float32)
              + b2c_ref[...])                           # (TM, C) f32
    m = jnp.max(logits, axis=-1, keepdims=True)
    e = jnp.exp(logits - m)
    inv = pl.reciprocal(jnp.sum(e, axis=-1, keepdims=True), approx=True)   # EUP vrcp
    c_att = e * inv                                     # (TM, C) f32
    refined = (common.astype(jnp.float32) * c_att).astype(dt)

    # ---- Fusion 1x1 conv on channel-concat: single (2C, C) weight, f32 accumulate ----
    cat = jnp.concatenate([enhanced, refined], axis=-1)                    # (TM, 2C)
    out_ref[0] = (jnp.dot(cat, wf_ref[...], preferred_element_type=jnp.float32)
                  + bf_ref[...]).astype(out_ref.dtype)


# ----------------------------------------------------------------------------------
# Host-side pieces
# ----------------------------------------------------------------------------------
def _differential_attention(rgb, ir, w1d, b1d, w2d, b2d):
    """Hoisted DifferentialEnhanciveModule attention (needs global spatial pooling)."""
    diff = (rgb.astype(jnp.float32) - ir.astype(jnp.float32)) * 0.5         # (N, HW, C)
    s = (jnp.mean(diff, axis=1, keepdims=True)
         + jnp.max(diff, axis=1, keepdims=True))                            # (N, 1, C)
    h = jnp.maximum(s @ w1d + b1d, 0.0)                                     # (N, 1, Cr)
    return jax.nn.sigmoid(h @ w2d + b2d)                                    # (N, 1, C) f32


def _pick_tile(HW, C, itemsize, budget_bytes=28 * 1024 * 1024, max_tm=2048):
    """Largest multiple-of-8 divisor of HW whose VMEM working set fits the budget.

    The 28 MiB budget is sized for v7x (64 MiB VMEM / 32 MiB scoped default);
    on v5e/v6e (128 MiB VMEM) the budget/cap can be raised for even larger tiles.
    """
    def vmem_est(tm):
        io = 3 * 2 * tm * C * itemsize            # rgb/ir/out, double-buffered
        inter = tm * C * (6 * 4 + 2 * itemsize)   # f32 intermediates + (TM, 2C) concat
        return io + inter

    cands = [t for t in range(8, min(HW, max_tm) + 1, 8)
             if HW % t == 0 and vmem_est(t) <= budget_bytes]
    return max(cands) if cands else HW            # full-extent block is always legal


def _make_call(N, HW, C, Cr, tm, dtype, resident_weights, vmem_limit):
    act_spec = lambda: pl.BlockSpec((1, tm, C), lambda n, t: (n, t, 0))
    datt_spec = pl.BlockSpec((1, 1, C), lambda n, t: (n, 0, 0))
    if resident_weights:
        # Whole array pinned once in VMEM: no per-step pipelining / no double-buffer.
        w_spec = lambda shape: pl.BlockSpec(memory_space=pltpu.MemorySpace.VMEM)
    else:
        # Fallback: constant-index blocked specs (pipeline re-uses the block; costs an
        # extra buffer per weight but is supported everywhere).
        w_spec = lambda shape: pl.BlockSpec(shape, lambda n, t: (0, 0))

    return pl.pallas_call(
        _cmaff_kernel,
        out_shape=jax.ShapeDtypeStruct((N, HW, C), dtype),
        grid_spec=pltpu.PrefetchScalarGridSpec(
            num_scalar_prefetch=0,
            grid=(N, HW // tm),
            in_specs=[
                datt_spec, act_spec(), act_spec(),
                w_spec((C, Cr)), w_spec((1, Cr)),
                w_spec((Cr, C)), w_spec((1, C)),
                w_spec((2 * C, C)), w_spec((1, C)),
            ],
            out_specs=act_spec(),
        ),
        compiler_params=pltpu.CompilerParams(
            dimension_semantics=("parallel", "parallel"),
            vmem_limit_bytes=vmem_limit,
        ),
    )


def cmaff_pallas(rgb, ir, params, *, tm=None):
    """rgb, ir: (N, HW, C) float32 or bfloat16. Returns (N, HW, C) in the same dtype."""
    N, HW, C = rgb.shape
    (w1d, b1d, w2d, b2d, w1c, b1c, w2c, b2c, wf, bf) = params
    Cr = w1c.shape[1]
    dtype = rgb.dtype

    # Tiny global-pool attention computed outside the kernel (kept in f32).
    d_att = _differential_attention(rgb, ir, w1d, b1d, w2d, b2d)

    if tm is None:
        tm = _pick_tile(HW, C, jnp.dtype(dtype).itemsize)
    if HW % tm != 0 or not (tm % 8 == 0 or tm == HW):
        raise ValueError(f"invalid spatial tile tm={tm} for HW={HW}")

    # Matmul weights follow the activation dtype (bf16 -> bf16 MXU); biases stay f32.
    cast = lambda w: w.astype(dtype)
    f32 = lambda b: b.astype(jnp.float32)
    args = (d_att, rgb, ir, cast(w1c), f32(b1c), cast(w2c), f32(b2c), cast(wf), f32(bf))

    vmem_limit = 64 * 1024 * 1024   # above the 16/32 MiB scoped defaults, <= v7x physical

    try:
        out = _make_call(N, HW, C, Cr, tm, dtype, True, vmem_limit)(*args)
        return jax.block_until_ready(out)
    except Exception:
        out = _make_call(N, HW, C, Cr, tm, dtype, False, vmem_limit)(*args)
        return jax.block_until_ready(out)


# ----------------------------------------------------------------------------------
# Pure-JAX reference (mirrors the PyTorch forward) and param init
# ----------------------------------------------------------------------------------
def cmaff_reference(rgb, ir, params):
    (w1d, b1d, w2d, b2d, w1c, b1c, w2c, b2c, wf, bf) = params
    rgb = rgb.astype(jnp.float32)
    ir = ir.astype(jnp.float32)
    diff = (rgb - ir) / 2.0
    common = (rgb + ir) / 2.0
    # differential module
    s = jnp.mean(diff, axis=1, keepdims=True) + jnp.max(diff, axis=1, keepdims=True)
    d_att = jax.nn.sigmoid(jnp.maximum(s @ w1d + b1d, 0.0) @ w2d + b2d)
    enhanced = diff * (1.0 + d_att)
    # common module
    c_att = jax.nn.softmax(jnp.maximum(common @ w1c + b1c, 0.0) @ w2c + b2c, axis=-1)
    refined = common * c_att
    # fusion conv1x1 on channel concat
    return jnp.concatenate([enhanced, refined], axis=-1) @ wf + bf


def init_params(key, C):
    """PyTorch conv1x1 weights (Cout, Cin, 1, 1) are stored transposed as (Cin, Cout)."""
    Cr = max(C // 16, 1)
    ks = jax.random.split(key, 10)

    def w(k, cin, cout):
        return jax.random.normal(k, (cin, cout), jnp.float32) / np.sqrt(cin)

    def b(k, cout):
        return jax.random.normal(k, (1, cout), jnp.float32) * 0.01

    w1d, b1d = w(ks[0], C, Cr), b(ks[1], Cr)
    w2d, b2d = w(ks[2], Cr, C), b(ks[3], C)
    w1c, b1c = w(ks[4], C, Cr), b(ks[5], Cr)
    w2c, b2c = w(ks[6], Cr, C), b(ks[7], C)
    wf = w(ks[8], 2 * C, C)     # fusion conv: weight (C, 2C) in torch -> (2C, C) here
    bf = b(ks[9], C)
    return (w1d, b1d, w2d, b2d, w1c, b1c, w2c, b2c, wf, bf)


# ----------------------------------------------------------------------------------
if __name__ == "__main__":
    key = jax.random.PRNGKey(0)
    N, C, H, W = 2, 128, 16, 16        # C=128 keeps the lane dim dense; Cr = C//16 = 8
    HW = H * W

    k1, k2, k3 = jax.random.split(key, 3)
    # NCHW inputs (like PyTorch), then convert to kernel layout (N, HW, C)
    rgb_nchw = jax.random.normal(k1, (N, C, H, W), jnp.float32)
    ir_nchw = jax.random.normal(k2, (N, C, H, W), jnp.float32)
    rgb = rgb_nchw.reshape(N, C, HW).transpose(0, 2, 1)
    ir = ir_nchw.reshape(N, C, HW).transpose(0, 2, 1)

    params = init_params(k3, C)
    ref = cmaff_reference(rgb, ir, params)

    # f32 path, forced multi-tile spatial grid (grid = (N, HW // 64) = (2, 4)).
    out_f32 = jax.block_until_ready(cmaff_pallas(rgb, ir, params, tm=64))
    np.testing.assert_allclose(np.asarray(out_f32), np.asarray(ref),
                               rtol=1e-3, atol=1e-3)

    # bf16 activations + weights (half HBM traffic, 2x MXU), auto-picked tile.
    out_bf16 = jax.block_until_ready(
        cmaff_pallas(rgb.astype(jnp.bfloat16), ir.astype(jnp.bfloat16), params))
    np.testing.assert_allclose(np.asarray(out_bf16.astype(jnp.float32)),
                               np.asarray(ref), rtol=8e-2, atol=8e-2)

    print("KERNEL_OK")
</pallas_src>

<mosaic_0001>
module attributes {stable_mosaic.version = 11 : i64} {
  func.func @_cmaff_kernel(%arg0: i32, %arg1: i32, %arg2: memref<1x1x128xf32, #tpu.memory_space<vmem>>, %arg3: memref<1x64x128xf32, #tpu.memory_space<vmem>>, %arg4: memref<1x64x128xf32, #tpu.memory_space<vmem>>, %arg5: memref<128x8xf32, #tpu.memory_space<vmem>>, %arg6: memref<1x8xf32, #tpu.memory_space<vmem>>, %arg7: memref<8x128xf32, #tpu.memory_space<vmem>>, %arg8: memref<1x128xf32, #tpu.memory_space<vmem>>, %arg9: memref<256x128xf32, #tpu.memory_space<vmem>>, %arg10: memref<1x128xf32, #tpu.memory_space<vmem>>, %arg11: memref<1x64x128xf32, #tpu.memory_space<vmem>>) attributes {dimension_semantics = [#tpu.dimension_semantics<parallel>, #tpu.dimension_semantics<parallel>], iteration_bounds = array<i64: 2, 4>, scalar_prefetch = 0 : i64, scratch_operands = 0 : i64, tpu.core_type = #tpu.core_type<tc>, window_params = [{transform_indices = @transform_0, window_bounds = array<i64: 1, 1, 128>}, {transform_indices = @transform_1, window_bounds = array<i64: 1, 64, 128>}, {transform_indices = @transform_2, window_bounds = array<i64: 1, 64, 128>}, {pipeline_mode = #tpu.pipeline_mode<synchronous>, transform_indices = @transform_3, window_bounds = array<i64: 128, 8>}, {pipeline_mode = #tpu.pipeline_mode<synchronous>, transform_indices = @transform_4, window_bounds = array<i64: 1, 8>}, {pipeline_mode = #tpu.pipeline_mode<synchronous>, transform_indices = @transform_5, window_bounds = array<i64: 8, 128>}, {pipeline_mode = #tpu.pipeline_mode<synchronous>, transform_indices = @transform_6, window_bounds = array<i64: 1, 128>}, {pipeline_mode = #tpu.pipeline_mode<synchronous>, transform_indices = @transform_7, window_bounds = array<i64: 256, 128>}, {pipeline_mode = #tpu.pipeline_mode<synchronous>, transform_indices = @transform_8, window_bounds = array<i64: 1, 128>}, {transform_indices = @transform_9, window_bounds = array<i64: 1, 64, 128>}]} {
    %c0 = arith.constant 0 : index
    %c0_0 = arith.constant 0 : index
    %c0_1 = arith.constant 0 : index
    %0 = vector.load %arg3[%c0, %c0_0, %c0_1] : memref<1x64x128xf32, #tpu.memory_space<vmem>>, vector<1x64x128xf32>
    %1 = vector.shape_cast %0 : vector<1x64x128xf32> to vector<64x128xf32>
    %c0_2 = arith.constant 0 : index
    %c0_3 = arith.constant 0 : index
    %c0_4 = arith.constant 0 : index
    %2 = vector.load %arg4[%c0_2, %c0_3, %c0_4] : memref<1x64x128xf32, #tpu.memory_space<vmem>>, vector<1x64x128xf32>
    %3 = vector.shape_cast %2 : vector<1x64x128xf32> to vector<64x128xf32>
    %4 = arith.subf %1, %3 : vector<64x128xf32>
    %cst = arith.constant 5.000000e-01 : f32
    %5 = vector.broadcast %cst : f32 to vector<64x128xf32>
    %6 = arith.mulf %4, %5 : vector<64x128xf32>
    %7 = arith.addf %1, %3 : vector<64x128xf32>
    %cst_5 = arith.constant 5.000000e-01 : f32
    %8 = vector.broadcast %cst_5 : f32 to vector<64x128xf32>
    %9 = arith.mulf %7, %8 : vector<64x128xf32>
    %c0_6 = arith.constant 0 : index
    %c0_7 = arith.constant 0 : index
    %c0_8 = arith.constant 0 : index
    %10 = vector.load %arg2[%c0_6, %c0_7, %c0_8] : memref<1x1x128xf32, #tpu.memory_space<vmem>>, vector<1x1x128xf32>
    %11 = vector.shape_cast %10 : vector<1x1x128xf32> to vector<1x128xf32>
    %cst_9 = arith.constant 1.000000e+00 : f32
    %12 = vector.broadcast %cst_9 : f32 to vector<1x128xf32>
    %13 = arith.addf %12, %11 : vector<1x128xf32>
    %14 = vector.broadcast %13 : vector<1x128xf32> to vector<64x128xf32>
    %15 = arith.mulf %6, %14 : vector<64x128xf32>
    %c0_10 = arith.constant 0 : index
    %c0_11 = arith.constant 0 : index
    %16 = vector.load %arg5[%c0_10, %c0_11] : memref<128x8xf32, #tpu.memory_space<vmem>>, vector<128x8xf32>
    %cst_12 = arith.constant dense<0.000000e+00> : vector<64x8xf32>
    %17 = tpu.matmul %9, %16, %cst_12 {dimension_numbers = #tpu.dot_dimension_numbers<[1], [0], [0], [1], [0, 0, 1, 1], [], []>} : vector<64x128xf32>, vector<128x8xf32>, vector<64x8xf32> -> vector<64x8xf32>
    %c0_13 = arith.constant 0 : index
    %c0_14 = arith.constant 0 : index
    %18 = vector.load %arg6[%c0_13, %c0_14] : memref<1x8xf32, #tpu.memory_space<vmem>>, vector<1x8xf32>
    %19 = vector.broadcast %18 : vector<1x8xf32> to vector<64x8xf32>
    %20 = arith.addf %17, %19 : vector<64x8xf32>
    %cst_15 = arith.constant 0.000000e+00 : f32
    %21 = vector.broadcast %cst_15 : f32 to vector<64x8xf32>
    %22 = arith.maximumf %20, %21 : vector<64x8xf32>
    %c0_16 = arith.constant 0 : index
    %c0_17 = arith.constant 0 : index
    %23 = vector.load %arg7[%c0_16, %c0_17] : memref<8x128xf32, #tpu.memory_space<vmem>>, vector<8x128xf32>
    %cst_18 = arith.constant dense<0.000000e+00> : vector<64x128xf32>
    %24 = tpu.matmul %22, %23, %cst_18 {dimension_numbers = #tpu.dot_dimension_numbers<[1], [0], [0], [1], [0, 0, 1, 1], [], []>} : vector<64x8xf32>, vector<8x128xf32>, vector<64x128xf32> -> vector<64x128xf32>
    %c0_19 = arith.constant 0 : index
    %c0_20 = arith.constant 0 : index
    %25 = vector.load %arg8[%c0_19, %c0_20] : memref<1x128xf32, #tpu.memory_space<vmem>>, vector<1x128xf32>
    %26 = vector.broadcast %25 : vector<1x128xf32> to vector<64x128xf32>
    %27 = arith.addf %24, %26 : vector<64x128xf32>
    %cst_21 = arith.constant dense<0xFF800000> : vector<64xf32>
    %28 = vector.multi_reduction <maximumf>, %27, %cst_21 [1] : vector<64x128xf32> to vector<64xf32>
    %29 = vector.shape_cast %28 : vector<64xf32> to vector<64x1xf32>
    %30 = vector.broadcast %29 : vector<64x1xf32> to vector<64x128xf32>
    %31 = arith.subf %27, %30 : vector<64x128xf32>
    %32 = math.exp %31 : vector<64x128xf32>
    %cst_22 = arith.constant dense<0.000000e+00> : vector<64xf32>
    %33 = vector.multi_reduction <add>, %32, %cst_22 [1] : vector<64x128xf32> to vector<64xf32>
    %34 = vector.shape_cast %33 : vector<64xf32> to vector<64x1xf32>
    %35 = tpu.reciprocal %34 {approx = true} : vector<64x1xf32> -> vector<64x1xf32>
    %36 = vector.broadcast %35 : vector<64x1xf32> to vector<64x128xf32>
    %37 = arith.mulf %32, %36 : vector<64x128xf32>
    %38 = arith.mulf %9, %37 : vector<64x128xf32>
    %39 = tpu.concatenate %15, %38 in 1 : vector<64x128xf32>, vector<64x128xf32> -> vector<64x256xf32>
    %c0_23 = arith.constant 0 : index
    %c0_24 = arith.constant 0 : index
    %40 = vector.load %arg9[%c0_23, %c0_24] : memref<256x128xf32, #tpu.memory_space<vmem>>, vector<256x128xf32>
    %cst_25 = arith.constant dense<0.000000e+00> : vector<64x128xf32>
    %41 = tpu.matmul %39, %40, %cst_25 {dimension_numbers = #tpu.dot_dimension_numbers<[1], [0], [0], [1], [0, 0, 1, 1], [], []>} : vector<64x256xf32>, vector<256x128xf32>, vector<64x128xf32> -> vector<64x128xf32>
    %c0_26 = arith.constant 0 : index
    %c0_27 = arith.constant 0 : index
    %42 = vector.load %arg10[%c0_26, %c0_27] : memref<1x128xf32, #tpu.memory_space<vmem>>, vector<1x128xf32>
    %43 = vector.broadcast %42 : vector<1x128xf32> to vector<64x128xf32>
    %44 = arith.addf %41, %43 : vector<64x128xf32>
    %c0_28 = arith.constant 0 : index
    %c0_29 = arith.constant 0 : index
    %c0_30 = arith.constant 0 : index
    %45 = vector.load %arg11[%c0_28, %c0_29, %c0_30] : memref<1x64x128xf32, #tpu.memory_space<vmem>>, vector<1x64x128xf32>
    %46 = vector.shape_cast %45 : vector<1x64x128xf32> to vector<64x128xf32>
    %47 = vector.shape_cast %44 : vector<64x128xf32> to vector<1x64x128xf32>
    tpu.vector_store %arg11[%c0_28, %c0_29, %c0_30], %47 {strides = array<i32>} : memref<1x64x128xf32, #tpu.memory_space<vmem>>, vector<1x64x128xf32>,
    return
  }
  func.func @transform_0(%arg0: i32, %arg1: i32) -> (i32, i32, i32) {
    %c0_i32 = arith.constant 0 : i32
    %c0_i32_0 = arith.constant 0 : i32
    %c0_i32_1 = arith.constant 0 : i32
    return %arg0, %c0_i32, %c0_i32_0 : i32, i32, i32
  }
  func.func @transform_1(%arg0: i32, %arg1: i32) -> (i32, i32, i32) {
    %c0_i32 = arith.constant 0 : i32
    %c0_i32_0 = arith.constant 0 : i32
    return %arg0, %arg1, %c0_i32 : i32, i32, i32
  }
  func.func @transform_2(%arg0: i32, %arg1: i32) -> (i32, i32, i32) {
    %c0_i32 = arith.constant 0 : i32
    %c0_i32_0 = arith.constant 0 : i32
    return %arg0, %arg1, %c0_i32 : i32, i32, i32
  }
  func.func @transform_3(%arg0: i32, %arg1: i32) -> (i32, i32) {
    %c0_i32 = arith.constant 0 : i32
    %c0_i32_0 = arith.constant 0 : i32
    %c0_i32_1 = arith.constant 0 : i32
    return %c0_i32, %c0_i32_0 : i32, i32
  }
  func.func @transform_4(%arg0: i32, %arg1: i32) -> (i32, i32) {
    %c0_i32 = arith.constant 0 : i32
    %c0_i32_0 = arith.constant 0 : i32
    %c0_i32_1 = arith.constant 0 : i32
    return %c0_i32, %c0_i32_0 : i32, i32
  }
  func.func @transform_5(%arg0: i32, %arg1: i32) -> (i32, i32) {
    %c0_i32 = arith.constant 0 : i32
    %c0_i32_0 = arith.constant 0 : i32
    %c0_i32_1 = arith.constant 0 : i32
    return %c0_i32, %c0_i32_0 : i32, i32
  }
  func.func @transform_6(%arg0: i32, %arg1: i32) -> (i32, i32) {
    %c0_i32 = arith.constant 0 : i32
    %c0_i32_0 = arith.constant 0 : i32
    %c0_i32_1 = arith.constant 0 : i32
    return %c0_i32, %c0_i32_0 : i32, i32
  }
  func.func @transform_7(%arg0: i32, %arg1: i32) -> (i32, i32) {
    %c0_i32 = arith.constant 0 : i32
    %c0_i32_0 = arith.constant 0 : i32
    %c0_i32_1 = arith.constant 0 : i32
    return %c0_i32, %c0_i32_0 : i32, i32
  }
  func.func @transform_8(%arg0: i32, %arg1: i32) -> (i32, i32) {
    %c0_i32 = arith.constant 0 : i32
    %c0_i32_0 = arith.constant 0 : i32
    %c0_i32_1 = arith.constant 0 : i32
    return %c0_i32, %c0_i32_0 : i32, i32
  }
  func.func @transform_9(%arg0: i32, %arg1: i32) -> (i32, i32, i32) {
    %c0_i32 = arith.constant 0 : i32
    %c0_i32_0 = arith.constant 0 : i32
    return %arg0, %arg1, %c0_i32 : i32, i32, i32
  }
}

module attributes {stable_mosaic.version = 11 : i64} {
  func.func @_cmaff_kernel(%arg0: i32, %arg1: i32, %arg2: memref<1x1x128xf32, #tpu.memory_space<vmem>>, %arg3: memref<1x64x128xf32, #tpu.memory_space<vmem>>, %arg4: memref<1x64x128xf32, #tpu.memory_space<vmem>>, %arg5: memref<128x8xf32, #tpu.memory_space<vmem>>, %arg6: memref<1x8xf32, #tpu.memory_space<vmem>>, %arg7: memref<8x128xf32, #tpu.memory_space<vmem>>, %arg8: memref<1x128xf32, #tpu.memory_space<vmem>>, %arg9: memref<256x128xf32, #tpu.memory_space<vmem>>, %arg10: memref<1x128xf32, #tpu.memory_space<vmem>>, %arg11: memref<1x64x128xf32, #tpu.memory_space<vmem>>) attributes {dimension_semantics = [#tpu.dimension_semantics<parallel>, #tpu.dimension_semantics<parallel>], iteration_bounds = array<i64: 2, 4>, scalar_prefetch = 0 : i64, scratch_operands = 0 : i64, tpu.core_type = #tpu.core_type<tc>, window_params = [{transform_indices = @transform_0, window_bounds = array<i64: 1, 1, 128>}, {transform_indices = @transform_1, window_bounds = array<i64: 1, 64, 128>}, {transform_indices = @transform_2, window_bounds = array<i64: 1, 64, 128>}, {pipeline_mode = #tpu.pipeline_mode<synchronous>, transform_indices = @transform_3, window_bounds = array<i64: 128, 8>}, {pipeline_mode = #tpu.pipeline_mode<synchronous>, transform_indices = @transform_4, window_bounds = array<i64: 1, 8>}, {pipeline_mode = #tpu.pipeline_mode<synchronous>, transform_indices = @transform_5, window_bounds = array<i64: 8, 128>}, {pipeline_mode = #tpu.pipeline_mode<synchronous>, transform_indices = @transform_6, window_bounds = array<i64: 1, 128>}, {pipeline_mode = #tpu.pipeline_mode<synchronous>, transform_indices = @transform_7, window_bounds = array<i64: 256, 128>}, {pipeline_mode = #tpu.pipeline_mode<synchronous>, transform_indices = @transform_8, window_bounds = array<i64: 1, 128>}, {transform_indices = @transform_9, window_bounds = array<i64: 1, 64, 128>}]} {
    %c0 = arith.constant 0 : index
    %c0_0 = arith.constant 0 : index
    %c0_1 = arith.constant 0 : index
    %0 = vector.load %arg3[%c0, %c0_0, %c0_1] : memref<1x64x128xf32, #tpu.memory_space<vmem>>, vector<1x64x128xf32>
    %1 = vector.shape_cast %0 : vector<1x64x128xf32> to vector<64x128xf32>
    %c0_2 = arith.constant 0 : index
    %c0_3 = arith.constant 0 : index
    %c0_4 = arith.constant 0 : index
    %2 = vector.load %arg4[%c0_2, %c0_3, %c0_4] : memref<1x64x128xf32, #tpu.memory_space<vmem>>, vector<1x64x128xf32>
    %3 = vector.shape_cast %2 : vector<1x64x128xf32> to vector<64x128xf32>
    %4 = arith.subf %1, %3 : vector<64x128xf32>
    %cst = arith.constant 5.000000e-01 : f32
    %5 = vector.broadcast %cst : f32 to vector<64x128xf32>
    %6 = arith.mulf %4, %5 : vector<64x128xf32>
    %7 = arith.addf %1, %3 : vector<64x128xf32>
    %cst_5 = arith.constant 5.000000e-01 : f32
    %8 = vector.broadcast %cst_5 : f32 to vector<64x128xf32>
    %9 = arith.mulf %7, %8 : vector<64x128xf32>
    %c0_6 = arith.constant 0 : index
    %c0_7 = arith.constant 0 : index
    %c0_8 = arith.constant 0 : index
    %10 = vector.load %arg2[%c0_6, %c0_7, %c0_8] : memref<1x1x128xf32, #tpu.memory_space<vmem>>, vector<1x1x128xf32>
    %11 = vector.shape_cast %10 : vector<1x1x128xf32> to vector<1x128xf32>
    %cst_9 = arith.constant 1.000000e+00 : f32
    %12 = vector.broadcast %cst_9 : f32 to vector<1x128xf32>
    %13 = arith.addf %12, %11 : vector<1x128xf32>
    %14 = vector.broadcast %13 : vector<1x128xf32> to vector<64x128xf32>
    %15 = arith.mulf %6, %14 : vector<64x128xf32>
    %c0_10 = arith.constant 0 : index
    %c0_11 = arith.constant 0 : index
    %16 = vector.load %arg5[%c0_10, %c0_11] : memref<128x8xf32, #tpu.memory_space<vmem>>, vector<128x8xf32>
    %cst_12 = arith.constant dense<0.000000e+00> : vector<64x8xf32>
    %17 = tpu.matmul %9, %16, %cst_12 {dimension_numbers = #tpu.dot_dimension_numbers<[1], [0], [0], [1], [0, 0, 1, 1], [], []>} : vector<64x128xf32>, vector<128x8xf32>, vector<64x8xf32> -> vector<64x8xf32>
    %c0_13 = arith.constant 0 : index
    %c0_14 = arith.constant 0 : index
    %18 = vector.load %arg6[%c0_13, %c0_14] : memref<1x8xf32, #tpu.memory_space<vmem>>, vector<1x8xf32>
    %19 = vector.broadcast %18 : vector<1x8xf32> to vector<64x8xf32>
    %20 = arith.addf %17, %19 : vector<64x8xf32>
    %cst_15 = arith.constant 0.000000e+00 : f32
    %21 = vector.broadcast %cst_15 : f32 to vector<64x8xf32>
    %22 = arith.maximumf %20, %21 : vector<64x8xf32>
    %c0_16 = arith.constant 0 : index
    %c0_17 = arith.constant 0 : index
    %23 = vector.load %arg7[%c0_16, %c0_17] : memref<8x128xf32, #tpu.memory_space<vmem>>, vector<8x128xf32>
    %cst_18 = arith.constant dense<0.000000e+00> : vector<64x128xf32>
    %24 = tpu.matmul %22, %23, %cst_18 {dimension_numbers = #tpu.dot_dimension_numbers<[1], [0], [0], [1], [0, 0, 1, 1], [], []>} : vector<64x8xf32>, vector<8x128xf32>, vector<64x128xf32> -> vector<64x128xf32>
    %c0_19 = arith.constant 0 : index
    %c0_20 = arith.constant 0 : index
    %25 = vector.load %arg8[%c0_19, %c0_20] : memref<1x128xf32, #tpu.memory_space<vmem>>, vector<1x128xf32>
    %26 = vector.broadcast %25 : vector<1x128xf32> to vector<64x128xf32>
    %27 = arith.addf %24, %26 : vector<64x128xf32>
    %cst_21 = arith.constant dense<0xFF800000> : vector<64xf32>
    %28 = vector.multi_reduction <maximumf>, %27, %cst_21 [1] : vector<64x128xf32> to vector<64xf32>
    %29 = vector.shape_cast %28 : vector<64xf32> to vector<64x1xf32>
    %30 = vector.broadcast %29 : vector<64x1xf32> to vector<64x128xf32>
    %31 = arith.subf %27, %30 : vector<64x128xf32>
    %32 = math.exp %31 : vector<64x128xf32>
    %cst_22 = arith.constant dense<0.000000e+00> : vector<64xf32>
    %33 = vector.multi_reduction <add>, %32, %cst_22 [1] : vector<64x128xf32> to vector<64xf32>
    %34 = vector.shape_cast %33 : vector<64xf32> to vector<64x1xf32>
    %35 = tpu.reciprocal %34 {approx = true} : vector<64x1xf32> -> vector<64x1xf32>
    %36 = vector.broadcast %35 : vector<64x1xf32> to vector<64x128xf32>
    %37 = arith.mulf %32, %36 : vector<64x128xf32>
    %38 = arith.mulf %9, %37 : vector<64x128xf32>
    %39 = tpu.concatenate %15, %38 in 1 : vector<64x128xf32>, vector<64x128xf32> -> vector<64x256xf32>
    %c0_23 = arith.constant 0 : index
    %c0_24 = arith.constant 0 : index
    %40 = vector.load %arg9[%c0_23, %c0_24] : memref<256x128xf32, #tpu.memory_space<vmem>>, vector<256x128xf32>
    %cst_25 = arith.constant dense<0.000000e+00> : vector<64x128xf32>
    %41 = tpu.matmul %39, %40, %cst_25 {dimension_numbers = #tpu.dot_dimension_numbers<[1], [0], [0], [1], [0, 0, 1, 1], [], []>} : vector<64x256xf32>, vector<256x128xf32>, vector<64x128xf32> -> vector<64x128xf32>
    %c0_26 = arith.constant 0 : index
    %c0_27 = arith.constant 0 : index
    %42 = vector.load %arg10[%c0_26, %c0_27] : memref<1x128xf32, #tpu.memory_space<vmem>>, vector<1x128xf32>
    %43 = vector.broadcast %42 : vector<1x128xf32> to vector<64x128xf32>
    %44 = arith.addf %41, %43 : vector<64x128xf32>
    %c0_28 = arith.constant 0 : index
    %c0_29 = arith.constant 0 : index
    %c0_30 = arith.constant 0 : index
    %45 = vector.load %arg11[%c0_28, %c0_29, %c0_30] : memref<1x64x128xf32, #tpu.memory_space<vmem>>, vector<1x64x128xf32>
    %46 = vector.shape_cast %45 : vector<1x64x128xf32> to vector<64x128xf32>
    %47 = vector.shape_cast %44 : vector<64x128xf32> to vector<1x64x128xf32>
    tpu.vector_store %arg11[%c0_28, %c0_29, %c0_30], %47 {strides = array<i32>} : memref<1x64x128xf32, #tpu.memory_space<vmem>>, vector<1x64x128xf32>,
    return
  }
  func.func @transform_0(%arg0: i32, %arg1: i32) -> (i32, i32, i32) {
    %c0_i32 = arith.constant 0 : i32
    %c0_i32_0 = arith.constant 0 : i32
    %c0_i32_1 = arith.constant 0 : i32
    return %arg0, %c0_i32, %c0_i32_0 : i32, i32, i32
  }
  func.func @transform_1(%arg0: i32, %arg1: i32) -> (i32, i32, i32) {
    %c0_i32 = arith.constant 0 : i32
    %c0_i32_0 = arith.constant 0 : i32
    return %arg0, %arg1, %c0_i32 : i32, i32, i32
  }
  func.func @transform_2(%arg0: i32, %arg1: i32) -> (i32, i32, i32) {
    %c0_i32 = arith.constant 0 : i32
    %c0_i32_0 = arith.constant 0 : i32
    return %arg0, %arg1, %c0_i32 : i32, i32, i32
  }
  func.func @transform_3(%arg0: i32, %arg1: i32) -> (i32, i32) {
    %c0_i32 = arith.constant 0 : i32
    %c0_i32_0 = arith.constant 0 : i32
    %c0_i32_1 = arith.constant 0 : i32
    return %c0_i32, %c0_i32_0 : i32, i32
  }
  func.func @transform_4(%arg0: i32, %arg1: i32) -> (i32, i32) {
    %c0_i32 = arith.constant 0 : i32
    %c0_i32_0 = arith.constant 0 : i32
    %c0_i32_1 = arith.constant 0 : i32
    return %c0_i32, %c0_i32_0 : i32, i32
  }
  func.func @transform_5(%arg0: i32, %arg1: i32) -> (i32, i32) {
    %c0_i32 = arith.constant 0 : i32
    %c0_i32_0 = arith.constant 0 : i32
    %c0_i32_1 = arith.constant 0 : i32
    return %c0_i32, %c0_i32_0 : i32, i32
  }
  func.func @transform_6(%arg0: i32, %arg1: i32) -> (i32, i32) {
    %c0_i32 = arith.constant 0 : i32
    %c0_i32_0 = arith.constant 0 : i32
    %c0_i32_1 = arith.constant 0 : i32
    return %c0_i32, %c0_i32_0 : i32, i32
  }
  func.func @transform_7(%arg0: i32, %arg1: i32) -> (i32, i32) {
    %c0_i32 = arith.constant 0 : i32
    %c0_i32_0 = arith.constant 0 : i32
    %c0_i32_1 = arith.constant 0 : i32
    return %c0_i32, %c0_i32_0 : i32, i32
  }
  func.func @transform_8(%arg0: i32, %arg1: i32) -> (i32, i32) {
    %c0_i32 = arith.constant 0 : i32
    %c0_i32_0 = arith.constant 0 : i32
    %c0_i32_1 = arith.constant 0 : i32
    return %c0_i32, %c0_i32_0 : i32, i32
  }
  func.func @transform_9(%arg0: i32, %arg1: i32) -> (i32, i32, i32) {
    %c0_i32 = arith.constant 0 : i32
    %c0_i32_0 = arith.constant 0 : i32
    return %arg0, %arg1, %c0_i32 : i32, i32, i32
  }
}

</mosaic_0001>

<bundles_post_ra>
// kernel: tpu_custom_call.1
= control target key start
LH: loop header
LB: loop body
LE: loop exit
PB: predicated region body
PF: predicated region fallthrough
CT: control target
= control target key end

     0   :  { %s2198_s0 = inlined_call_operand.vmem [shape: f32[2,1,128], index: 0, kind: input, shape index: {}]   ;;  %s2199_s1 = inlined_call_operand.hbm [shape: f32[2,256,128], index: 1, kind: input, shape index: {}]   ;;  %s2200_s2 = inlined_call_operand.hbm [shape: f32[2,256,128], index: 2, kind: input, shape index: {}]   ;;  %s2201_s3 = inlined_call_operand.vmem [shape: f32[128,8], index: 3, kind: input, shape index: {}]   ;;  %s2202_s4 = inlined_call_operand.vmem [shape: f32[1,8], index: 4, kind: input, shape index: {}]   ;;  %s2203_s5 = inlined_call_operand.vmem [shape: f32[8,128], index: 5, kind: input, shape index: {}]   ;;  %s2204_s6 = inlined_call_operand.vmem [shape: f32[1,128], index: 6, kind: input, shape index: {}]   ;;  %s2205_s7 = inlined_call_operand.hbm [shape: f32[256,128], index: 7, kind: input, shape index: {}]   ;;  %s2206_s8 = inlined_call_operand.vmem [shape: f32[1,128], index: 8, kind: input, shape index: {}]   ;;  %s2207_s9 = inlined_call_operand.hbm [shape: f32[2,256,128], index: 9, kind: output, shape index: {}]  }
   0x1   :  { %2220 = sst [smem:[#allocation20_spill]] %s2198_s0 }
   0x2   :  { %2221 = sst [smem:[#allocation21_spill]] %s2205_s7 }
   0x3   :  { %2222 = sst [smem:[#allocation22_spill]] %s2206_s8 }
   0x4   :  { %2223 = sst [smem:[#allocation23_spill]] %s2207_s9 }
   0x5   :  { %14 = vsyncpa [#allocation3], 0 }
   0x6   :  { %16 = vsyncpa [#allocation3 + $0x1], 0 }
   0x7   :  { %17 = vsyncpa [#allocation6], 0 }
   0x8   :  { %19 = vsyncpa [#allocation6 + $0x1], 0 }
   0x9   :  { %20 = vsyncpa [#allocation4], 0 }
   0xa   :  { %22 = vsyncpa [#allocation4 + $0x1], 0  ;;  %s1722_s30 = smov 0   ;;  %s1724_s10 = smov 0  }
   0xb   :  { %s1726_s11 = smov 0   ;;  %s1728_s12 = smov 0  }
   0xc   :  { %s1730_s13 = smov 0   ;;  %s1732_s14 = smov 0  }
   0xd   :  { %s1734_s15 = smov 0   ;;  %s1736_s16 = smov 0  }
   0xe LB: > { %2224 = sst [smem:[#allocation13_spill]] %s1634_s30  ;;  %s1763_s17 = sadd.s32 4294967295, %s1662_s16   ;;  %s1662_s16 = sphi %s1736_s16, %s28_s16   ;;  %s1658_s15 = sphi %s1734_s15, %s2251_s15   ;;  %s1654_s14 = sphi %s1732_s14, %s2256_s14   ;;  %s1650_s13 = sphi %s1730_s13, %s2249_s13   ;;  %s1646_s12 = sphi %s1728_s12, %s2255_s12   ;;  %s1642_s11 = sphi %s1726_s11, %s2254_s11   ;;  %s1638_s10 = sphi %s1724_s10, %s2253_s10   ;;  %s1634_s30 = sphi %s1722_s30, %s2252_s30  }
   0xf   : > { %2225 = sst [smem:[#allocation14_spill]] %s1646_s12  ;;  %s1165_s18 = sadd.s32 4294967294, %s1662_s16  }
  0x10   : > { %2226 = sst [smem:[#allocation15_spill]] %s1658_s15  ;;  %p88_p0 = scmp.ne.s32.totalorder %s1638_s10, %s1634_s30 }
  0x11   : > { %p89_p1 = scmp.eq.s32.totalorder %s1763_s17, 0  ;;  %p274_p3 = scmp.eq.s32.totalorder %s1165_s18, 7 }
  0x12   : > { %p1166_p5 = scmp.ge.s32.totalorder %s1662_s16, 1  ;;  %p281_p7 = scmp.lt.s32.totalorder %s1662_s16, 9 }
  0x13   : > { %p1772_p4 = por %p89_p1, %p88_p0  ;;  %p1777_p6 = por %p274_p3, %p88_p0 }
  0x14   : > { %p1782_p8 = pnand %p1166_p5, %p281_p7  ;;  %s1664_s22 = smov [#allocation7]  }
  0x15   : > { %s2228_s20 = scalar_select %p1777_p6, 1, 0 }
  0x16   : > { %s305_s23 = sshll.u32 %s1664_s22, 4  ;;  %p1356_p9 = pneg %p1782_p8  ;;  %s306_s23 = int_to_ptr.vmem [resolvable:$true] %s305_s23 }
  0x17   : > { %2229 = sst [smem:[#allocation16_spill]] %s2228_s20  ;;  %s1487_s24 = scalar_lea.vmem %s306_s23, 4096 }
  0x18   : > { %p1357_p10 = pnand %p1356_p9, %p89_p1  ;;  %p1488_p12 = scmp.ne.s32.totalorder %s306_s23, %s1487_s24 }
  0x19   : > { %p1495_p3 = scmp.lt.s32.totalorder %s306_s23, %s306_s23  ;;  %p1496_p2 = scmp.lt.s32.totalorder %s1487_s24, %s1487_s24 }
  0x1a   : > { %p1478_p11 = pneg %p1357_p10 }
  0x1b   : > { %p1497_p6 = por %p1496_p2, %p1495_p3 }
  0x1c   : > { %p1490_p13 = pnand %p1488_p12, %p1478_p11 }
  0x1e   : > { %p1491_p0 = pneg %p1490_p13 }
  0x20   : > { %p1498_p5 = pnand %p1497_p6, %p1491_p0 }
  0x22   : > { %1501 = shalt.err (!%p1498_p5)
}
  0x23   : > { %s2208_s25 = smov 128   ;;  %s2210_s26 = smov 8  }
  0x24   : > { %s2231_s7 = sld [smem:[#allocation21_spill]]  ;;  %s37_s29 = sadd.s32 1, %s1654_s14 }
  0x25   : > { %p38_p2 = scmp.ge.s32.totalorder %s37_s29, 4  ;;  %s40_s18 = sadd.s32 1, %s1658_s15 }
  0x26   : > { %s75_s22 = sadd.s32 1, %s1642_s11  ;;  %p82_p6 = scmp.ne.s32.totalorder %s1642_s11, %s1638_s10 }
  0x27   : > { %s2258_s29 = smov (%p38_p2, %s37_s29), 0  ;;  %s2260_s18 = smov (!%p38_p2, %s40_s18), %s1658_s15 }
  0x28   : > { %2232 = sst [smem:[#allocation17_spill]] %s2258_s29  ;;  %s71_s24 = ssub.s32 %s1654_s14, %s2258_s29 }
  0x29   : > { %p83_p7 = scmp.eq.s32.totalorder %s1662_s16, 0  ;;  %p42_p9 = scmp.ge.s32.totalorder %s2260_s18, 2 }
  0x2a   : > { %1359 = dma.hbm_to_vmem [thread:$0]  (!%p1357_p10), %s2231_s7, 4096, %s306_s23, [#allocation6], %s2208_s25, %s2208_s25, %s2210_s26  }
  0x2b   : > { %p2233_p11 = scmp.eq.s32.totalorder %s1763_s17, 7  ;;  %p1813_p10 = por %p83_p7, %p82_p6 }
  0x2c   : > { %p1372_p13 = scmp.lt.s32.totalorder %s1662_s16, 8  ;;  %s2262_s18 = smov (%p42_p9, %s2260_s18), 0 }
  0x2d   : > { %p1809_p12 = por %p2233_p11, %p82_p6  ;;  %2237 = sst [smem:[#allocation19_spill]] %s2262_s18 }
  0x2e   : > { %s328_s28 = sand.u32 1, %s1642_s11   ;;  %s1170_s25 = sshll.u32 %s1654_s14, 3 }
  0x2f   : > { %s2234_s27 = scalar_select %p1809_p12, 1, 0 }
  0x30   : > { %s70_s26 = ssub.s32 %s1658_s15, %s2262_s18  ;;  %s1824_s29 = sshll.u32 %s328_s28, 6 }
  0x31   : > { %2235 = sst [smem:[#allocation18_spill]] %s2234_s27  ;;  %s72_s7 = sor.u32 %s71_s24, %s70_s26 }
  0x32   : > { %p73_p0 = scmp.eq.s32.totalorder %s72_s7, 0  ;;  %s1171_s20 = sshll.u32 %s1658_s15, 5 }
  0x33   : > { %s332_s30 = scalar_lea.vmem [#allocation2], %s1824_s29  ;;  %s338_s12 = sadd.s32 %s1171_s20, %s1170_s25 }
  0x34   : > { %s341_s9 = sshll.u32 %s332_s30, 4  ;;  %s1172_s8 = sshll.u32 %s338_s12, 7  ;;  %s342_s9 = int_to_ptr.vmem [resolvable:$true] %s341_s9 }
  0x35   : > { %s1829_s27 = scalar_select %p73_p0, %s1642_s11, %s75_s22  }
  0x36   : > { %p1835_p3 = pnand %p1372_p13, %p1813_p10  ;;  %s340_s7 = scalar_lea.hbm %s2199_s1, %s1172_s8 }
  0x37   : > { %s1845_s30 = scalar_lea.hbm %s2200_s2, %s1172_s8  ;;  %s329_s20 = scalar_lea.sflag [#allocation3], %s328_s28 }
  0x38   : > { %p1504_p5 = pneg %p1835_p3  ;;  %s1515_s12 = scalar_lea.vmem %s342_s9, 1024 }
  0x39   : > { %p1516_p2 = scmp.ne.s32.totalorder %s342_s9, %s1515_s12  ;;  %s1667_s25 = smov [#allocation2]  }
  0x3a   : > { %s1520_s22 = sshll.u32 %s1667_s25, 4  ;;  %s1521_s22 = int_to_ptr.vmem [resolvable:$false] %s1520_s22 }
  0x3b   : > { %p1518_p6 = pnand %p1516_p2, %p1504_p5  ;;  %s1522_s18 = scalar_lea.vmem %s1521_s22, 2048 }
  0x3c   : > { %p1523_p9 = scmp.lt.s32.totalorder %s342_s9, %s1521_s22  ;;  %p1524_p11 = scmp.lt.s32.totalorder %s1522_s18, %s1515_s12 }
  0x3d   : > { %p1519_p7 = pneg %p1518_p6 }
  0x3e   : > { %p1525_p10 = por %p1524_p11, %p1523_p9 }
  0x40   : > { %p1526_p13 = pnand %p1525_p10, %p1519_p7 }
  0x42   : > { %1529 = shalt.err (!%p1526_p13)
}
  0x43   : > { %s2239_s8 = smov 8   ;;  %s2240_s15 = smov 128  }
  0x44   : > { %1363 = dma.hbm_to_vmem [thread:$0]  (!%p1835_p3), %s340_s7, 1024, %s342_s9, %s329_s20, %s2240_s15, %s2240_s15, %s2239_s8  }
  0x45   : > { %s355_s23 = scalar_lea.vmem [#allocation5], %s1824_s29  ;;  %s351_s26 = sand.u32 1, %s1662_s16  }
  0x46   : > { %s364_s28 = sshll.u32 %s355_s23, 4  ;;  %s352_s24 = scalar_lea.sflag [#allocation6], %s351_s26  ;;  %s365_s28 = int_to_ptr.vmem [resolvable:$true] %s364_s28 }
  0x47   : > { %s1543_s25 = scalar_lea.vmem %s365_s28, 1024  ;;  %s1668_s12 = smov [#allocation5]  }
  0x48   : > { %p1544_p0 = scmp.ne.s32.totalorder %s365_s28, %s1543_s25  ;;  %s1548_s22 = sshll.u32 %s1668_s12, 4  ;;  %s1549_s22 = int_to_ptr.vmem [resolvable:$false] %s1548_s22 }
  0x49   : > { %s1550_s18 = scalar_lea.vmem %s1549_s22, 2048  ;;  %p1551_p7 = scmp.lt.s32.totalorder %s365_s28, %s1549_s22 }
  0x4a   : > { %p1546_p2 = pnand %p1544_p0, %p1504_p5  ;;  %p1552_p9 = scmp.lt.s32.totalorder %s1550_s18, %s1543_s25 }
  0x4c   : > { %p1547_p6 = pneg %p1546_p2  ;;  %p1553_p11 = por %p1552_p9, %p1551_p7 }
  0x4e   : > { %p1554_p10 = pnand %p1553_p11, %p1547_p6 }
  0x50   : > { %1557 = shalt.err (!%p1554_p10)
}
  0x51   : > { %1366 = dma.hbm_to_vmem [thread:$0]  (!%p1835_p3), %s1845_s30, 1024, %s365_s28, %s352_s24, %s2240_s15, %s2240_s15, %s2239_s8  }
  0x52   : > { %376 = sbr.rel (%p1782_p8) target bundleno = 1078 (0x436), region = 56  ;;  %s1871_s9 = sand.u32 (!%p1782_p8), 1, %s1638_s10  }
  0x53   : > { %s1874_s29 = sshll.u32 (!%p1782_p8), %s1871_s9, 6  ;;  %s379_s7 = scalar_lea.sflag (!%p1782_p8), [#allocation3], %s1871_s9 }
  0x54   : > { %s1878_s20 = scalar_lea.vmem (!%p1782_p8), [#allocation2], %s1874_s29 }
  0x57   : > { %1617 = dma.done.wait (%p1772_p4), %s379_s7, 1024  }
  0x58   : > { %1619 = vsyncadd (%p1772_p4), %s379_s7, 4294966272  ;;  %s387_s0 = sand.u32 1, %s1763_s17   ;;  %s1886_s30 = scalar_lea.vmem [#allocation5], %s1874_s29 }
  0x59   : > { %s388_s21 = scalar_lea.sflag [#allocation6], %s387_s0 }
  0x5a   : > { %1621 = dma.done.wait (%p1772_p4), %s388_s21, 1024  }
  0x5b   : > { %1623 = vsyncadd (%p1772_p4), %s388_s21, 4294966272 }
  0x5c   : > { %1625 = dma.done.wait (%p89_p1), [#allocation6], 4096  }
  0x5d   : > { %1627 = vsyncadd (%p89_p1), [#allocation6], 4294963200  ;;  %v523_v0 = vld [vmem:[%s2201_s3 + $0x78] sm:$0xff]  ;;  %v522_v1 = vld [vmem:[%s2201_s3 + $0x70] sm:$0xff]  ;;  %vm652_vm0 = vcmask 64512   ;;  %p438_p1 = scmp.lt.s32.totalorder %s1650_s13, 1 }
  0x5e   : > { %1288 = vmatprep.subr.mxu0 %v523_v0  ;;  %v521_v2 = vld [vmem:[%s2201_s3 + $0x68] sm:$0xff]  ;;  %v520_v3 = vld [vmem:[%s2201_s3 + $0x60] sm:$0xff]  ;;  %v519_v6 = vld [vmem:[%s2201_s3 + $0x58] sm:$0xff]  ;;  %s2241_s12 = sld [smem:[#allocation20_spill]]  ;;  %s2127_s21 = scalar_lea.vmem [#allocation8], %s1874_s29 }
  0x5f   : > { %1289 = vmatpush3.msra.mxu0 %v523_v0  ;;  %v1909_v4 = vld [vmem:[%s1878_s20] sm:$0xff]  ;;  %v518_v9 = vld [vmem:[%s2201_s3 + $0x50] sm:$0xff]  ;;  %v517_v11 = vld [vmem:[%s2201_s3 + $0x48] sm:$0xff]  ;;  %s439_s17 = scalar_select %p438_p1, %s1650_s13, 1 }
  0x60   : > { %1290 = vmatprep.subr.mxu0 %v522_v1  ;;  %v1912_v5 = vld [vmem:[%s1886_s30] sm:$0xff]  ;;  %v515_v13 = vld [vmem:[%s2201_s3 + $0x38] sm:$0xff]  ;;  %v514_v14 = vld [vmem:[%s2201_s3 + $0x30] sm:$0xff]  ;;  %s2242_s0 = sld [smem:[#allocation22_spill]]  ;;  %s1195_s15 = sshll.u32 %s1650_s13, 5 }
  0x61   : > { %1291 = vmatpush3.msra.mxu0 %v522_v1  ;;  %v460_v7 = vsub.f32 %v1909_v4, %v1912_v5  ;;  %v476_v8 = vadd.f32 %v1912_v5, %v1909_v4  ;;  %v516_v12 = vld [vmem:[%s2201_s3 + $0x40] sm:$0xff]  ;;  %v513_v15 = vld [vmem:[%s2201_s3 + $0x28] sm:$0xff]  ;;  %v511_v17 = vld [vmem:[%s2201_s3 + $0x18] sm:$0xff]  ;;  %s2243_s8 = sld [smem:[#allocation14_spill]]  ;;  %s1015_s24 = scalar_lea.sflag [#allocation4], %s1871_s9 }
  0x62   : > { %1292 = vmatprep.subr.mxu0 %v521_v2  ;;  %v512_v16 = vld [vmem:[%s2201_s3 + $0x20] sm:$0xff]  ;;  %v1949_v18 = vld [vmem:[%s1878_s20 + $0x8] sm:$0xff]  ;;  %v1955_v20 = vld [vmem:[%s1878_s20 + $0x10] sm:$0xff]  ;;  %s2245_s26 = sld [smem:[#allocation23_spill]] }
  0x63   : > { %1293 = vmatpush3.msra.mxu0 %v521_v2  ;;  %v1924_v10 = vmul.f32 0.5, %v476_v8  ;;  %v1952_v19 = vld [vmem:[%s1886_s30 + $0x8] sm:$0xff]  ;;  %v1958_v21 = vld [vmem:[%s1886_s30 + $0x10] sm:$0xff]  ;;  %v1971_v26 = vld [vmem:[%s1878_s20 + $0x18] sm:$0xff] }
  0x64   : > { %1294 = vmatprep.subr.mxu0 %v520_v3  ;;  %v510_v22 = vld [vmem:[%s2201_s3 + $0x10] sm:$0xff]  ;;  %v477_v23 = vadd.f32 %v1952_v19, %v1949_v18  ;;  %v509_v24 = vld [vmem:[%s2201_s3 + $0x8] sm:$0xff]  ;;  %v478_v25 = vadd.f32 %v1958_v21, %v1955_v20  ;;  %v1974_v27 = vld [vmem:[%s1886_s30 + $0x18] sm:$0xff]  ;;  %s440_s22 = scalar_lea.vmem %s2241_s12, %s439_s17  ;;  %v462_v4 = vsub.f32 %v1955_v20, %v1958_v21  ;;  %s1669_s12 = smov [#allocation8]  }
  0x65   : > { %1295 = vmatpush3.msra.mxu0 %v520_v3  ;;  %1320 = vmatprep.mubr.f32.mxu0 %v1924_v10  ;;  %v1977_v28 = vld [vmem:[%s1878_s20 + $0x20] sm:$0xff]  ;;  %v479_v32 = vadd.f32 %v1974_v27, %v1971_v26  ;;  %v1994_v35 = vld [vmem:[%s1878_s20 + $0x28] sm:$0xff]  ;;  %v2003_v38 = vld [vmem:[%s1878_s20 + $0x30] sm:$0xff] }
  0x66   : > { %1296 = vmatprep.subr.mxu0 %v519_v6  ;;  %v1980_v29 = vld [vmem:[%s1886_s30 + $0x20] sm:$0xff]  ;;  %v1985_v31 = vmul.f32 0.5, %v477_v23  ;;  %v1989_v33 = vmul.f32 0.5, %v478_v25  ;;  %v1997_v36 = vld [vmem:[%s1886_s30 + $0x28] sm:$0xff]  ;;  %v2006_v39 = vld [vmem:[%s1886_s30 + $0x30] sm:$0xff] }
  0x67   : > { %1297 = vmatpush3.msra.mxu0 %v519_v6  ;;  %v508_v30 = vld [vmem:[%s2201_s3] sm:$0xff]  ;;  %v480_v34 = vadd.f32 %v1980_v29, %v1977_v28  ;;  %v2009_v40 = vmul.f32 0.5, %v479_v32  ;;  %v481_v41 = vadd.f32 %v1997_v36, %v1994_v35  ;;  %v482_v43 = vadd.f32 %v2006_v39, %v2003_v38  ;;  %v2019_v44 = vld [vmem:[%s1878_s20 + $0x38] sm:$0xff]  ;;  %s1194_s29 = sshll.u32 %s2243_s8, 3  ;;  %s1030_s20 = sshll.u32 %s2127_s21, 4  ;;  %s2138_s20 = int_to_ptr.vmem [resolvable:$true] %s1030_s20 }
  0x68   : > { %1298 = vmatprep.subr.mxu0 %v518_v9  ;;  %v644_v37 = vld [vmem:[%s2203_s5] sm:$0xff]  ;;  %v2022_v45 = vld [vmem:[%s1886_s30 + $0x38] sm:$0xff]  ;;  %s1027_s23 = sadd.s32 %s1195_s15, %s1194_s29  ;;  %s1558_s25 = scalar_lea.vmem %s2138_s20, 1024 }
  0x69   : > { %1299 = vmatpush3.msra.mxu0 %v518_v9  ;;  %v2014_v42 = vmul.f32 0.5, %v480_v34  ;;  %v2025_v46 = vmul.f32 0.5, %v481_v41  ;;  %v483_v47 = vadd.f32 %v2022_v45, %v2019_v44  ;;  %v2030_v48 = vmul.f32 0.5, %v482_v43  ;;  %v1182_v50 = vld [vmem:[%s2202_s4] ss:$0 sm:$0xff]  ;;  %s1196_s30 = sshll.u32 %s1027_s23, 7  ;;  %p1559_p4 = scmp.ne.s32.totalorder %s2138_s20, %s1558_s25 }
  0x6a   : > { %1300 = vmatprep.subr.mxu0 %v517_v11  ;;  %s2144_s17 = scalar_lea.hbm %s2245_s26, %s1196_s30 }
  0x6b   : > { %1301 = vmatpush3.msra.mxu0 %v517_v11  ;;  %v2033_v49 = vmul.f32 0.5, %v483_v47  ;;  %p1560_p8 = pnand %p1559_p4, %p1809_p12 }
  0x6c   : > { %1302 = vmatprep.subr.mxu0 %v516_v12 }
  0x6d   : > { %1303 = vmatpush3.msra.mxu0 %v516_v12  ;;  %p1561_p3 = pneg %p1560_p8 }
  0x6e   : > { %1304 = vmatprep.subr.mxu0 %v515_v13 }
  0x6f   : > { %1305 = vmatpush3.msra.mxu0 %v515_v13 }
  0x70   : > { %1306 = vmatprep.subr.mxu0 %v514_v14 }
  0x71   : > { %1307 = vmatpush3.msra.mxu0 %v514_v14 }
  0x72   : > { %1308 = vmatprep.subr.mxu0 %v513_v15 }
  0x73   : > { %1309 = vmatpush3.msra.mxu0 %v513_v15 }
  0x74   : > { %1310 = vmatprep.subr.mxu0 %v512_v16 }
  0x75   : > { %1311 = vmatpush3.msra.mxu0 %v512_v16  ;;  %v1183_v16 = vld [vmem:[%s2204_s6] ss:$0 sm:$0xff] }
  0x76   : > { %1312 = vmatprep.subr.mxu0 %v511_v17 }
  0x77   : > { %1313 = vmatpush3.msra.mxu0 %v511_v17 }
  0x78   : > { %1314 = vmatprep.subr.mxu0 %v510_v22 }
  0x79   : > { %1315 = vmatpush3.msra.mxu0 %v510_v22 }
  0x7a   : > { %1316 = vmatprep.subr.mxu0 %v509_v24 }
  0x7b   : > { %1317 = vmatpush3.msra.mxu0 %v509_v24 }
  0x7c   : > { %1318 = vmatprep.subr.mxu0 %v508_v30 }
  0x7d   : > { %1319 = vmatpush3.msra.mxu0 %v508_v30 }
  0x7e   : > { %1321 = vmatmul.mubr.f32.vlgmr.msra.gmra.mxu0 %v1985_v31  ;;  %1332 = vmatprep.subr.mxu0 %v644_v37 }
  0x7f   : > { %1323 = vmatprep.mubr.f32.mxu0 %v1989_v33  ;;  %1333 = vmatpush3.msra.mxu0 %v644_v37 }
  0x82   : > { %1324 = vmatmul.mubr.f32.gmra.mxu0 %v2009_v40 }
  0x83   : > { %1326 = vmatprep.mubr.f32.mxu0 %v2014_v42 }
  0x86   : > { %1327 = vmatmul.mubr.f32.gmra.mxu0 %v2025_v46 }
  0x87   : > { %1329 = vmatprep.mubr.f32.mxu0 %v2030_v48 }
  0x8a   : > { %1330 = vmatmul.mubr.f32.gmra.mxu0 %v2033_v49 }
 0x13e   : > { %v1322_v51 = vpop.f32.mrf.mxu0 }
 0x13f   : > { %v603_v52 = vadd.f32 %v1322_v51, %v1182_v50 }
 0x140   : > { %v597_v53 = vpop.f32.mrf.mxu0 }
 0x141   : > { %v598_v54 = vadd.f32 %v1182_v50, %v597_v53  ;;  %v637_v58 = vmax.f32 %v603_v52, 0.0  ;;  %v893_v53 = vld [vmem:[#allocation7 + $0xf8] sm:$0xff] }
 0x142   : > { %v1325_v55 = vpop.f32.mrf.mxu0  ;;  %1232 = vmatprep.subr.mxu1 %v893_v53 }
 0x143   : > { %v636_v56 = vmax.f32 %v598_v54, 0.0  ;;  %v613_v57 = vadd.f32 %v1325_v55, %v1182_v50  ;;  %v877_v54 = vld [vmem:[#allocation7 + $0x78] sm:$0xff]  ;;  %v892_v55 = vld [vmem:[#allocation7 + $0xf0] sm:$0xff] }
 0x144   : > { %v607_v59 = vpop.f32.mrf.mxu0  ;;  %1233 = vmatpush3.msra.mxu1 %v877_v54 }
 0x145   : > { %v608_v60 = vadd.f32 %v1182_v50, %v607_v59  ;;  %1334 = vmatprep.mubr.msk.f32.mxu0 %vm652_vm0, %v636_v56  ;;  %v639_v61 = vmax.f32 %v613_v57, 0.0  ;;  %v876_v56 = vld [vmem:[#allocation7 + $0x70] sm:$0xff]  ;;  %v891_v57 = vld [vmem:[#allocation7 + $0xe8] sm:$0xff]  ;;  %1234 = vmatprep.subr.mxu1 %v892_v55  ;;  %v890_v59 = vld [vmem:[#allocation7 + $0xe0] sm:$0xff] }
 0x146   : > { %v1328_v62 = vpop.f32.mrf.mxu0  ;;  %1335 = vmatmul.mubr.msk.f32.vlgmr.msra.gmra.mxu0 %vm652_vm0, %v637_v58  ;;  %v875_v58 = vld [vmem:[#allocation7 + $0x68] sm:$0xff]  ;;  %1235 = vmatpush3.msra.mxu1 %v876_v56 }
 0x147   : > { %v638_v63 = vmax.f32 %v608_v60, 0.0  ;;  %v623_v0 = vadd.f32 %v1328_v62, %v1182_v50  ;;  %1236 = vmatprep.subr.mxu1 %v891_v57  ;;  %v874_v60 = vld [vmem:[#allocation7 + $0x60] sm:$0xff]  ;;  %v873_v62 = vld [vmem:[#allocation7 + $0x58] sm:$0xff] }
 0x148   : > { %v617_v1 = vpop.f32.mrf.mxu0  ;;  %1237 = vmatpush3.msra.mxu1 %v875_v58  ;;  %v886_v57 = vld [vmem:[#allocation7 + $0xc0] sm:$0xff] }
 0x149   : > { %v618_v2 = vadd.f32 %v1182_v50, %v617_v1  ;;  %1337 = vmatprep.mubr.msk.f32.mxu0 %vm652_vm0, %v638_v63  ;;  %v641_v3 = vmax.f32 %v623_v0, 0.0  ;;  %1238 = vmatprep.subr.mxu1 %v890_v59  ;;  %v888_v63 = vld [vmem:[#allocation7 + $0xd0] sm:$0xff]  ;;  %v887_v1 = vld [vmem:[#allocation7 + $0xc8] sm:$0xff]  ;;  %v870_v59 = vld [vmem:[#allocation7 + $0x40] sm:$0xff] }
 0x14a   : > { %v1331_v6 = vpop.f32.mrf.mxu0  ;;  %1338 = vmatmul.mubr.msk.f32.gmra.mxu0 %vm652_vm0, %v639_v61  ;;  %v889_v61 = vld [vmem:[#allocation7 + $0xd8] sm:$0xff]  ;;  %1239 = vmatpush3.msra.mxu1 %v874_v60  ;;  %v872_v0 = vld [vmem:[#allocation7 + $0x50] sm:$0xff] }
 0x14b   : > { %v640_v8 = vmax.f32 %v618_v2, 0.0  ;;  %v633_v9 = vadd.f32 %v1331_v6, %v1182_v50  ;;  %1240 = vmatprep.subr.mxu1 %v889_v61  ;;  %v885_v61 = vld [vmem:[#allocation7 + $0xb8] sm:$0xff] }
 0x14c   : > { %v627_v11 = vpop.f32.mrf.mxu0  ;;  %1241 = vmatpush3.msra.mxu1 %v873_v62  ;;  %v869_v62 = vld [vmem:[#allocation7 + $0x38] sm:$0xff] }
 0x14d   : > { %v628_v12 = vadd.f32 %v1182_v50, %v627_v11  ;;  %1340 = vmatprep.mubr.msk.f32.mxu0 %vm652_vm0, %v640_v8  ;;  %v643_v13 = vmax.f32 %v633_v9, 0.0  ;;  %1242 = vmatprep.subr.mxu1 %v888_v63 }
 0x14e   : > { %1341 = vmatmul.mubr.msk.f32.gmra.mxu0 %vm652_vm0, %v641_v3  ;;  %1243 = vmatpush3.msra.mxu1 %v872_v0  ;;  %v884_v0 = vld [vmem:[#allocation7 + $0xb0] sm:$0xff] }
 0x14f   : > { %v642_v14 = vmax.f32 %v628_v12, 0.0  ;;  %1244 = vmatprep.subr.mxu1 %v887_v1  ;;  %v868_v1 = vld [vmem:[#allocation7 + $0x30] sm:$0xff] }
 0x151   : > { %1343 = vmatprep.mubr.msk.f32.mxu0 %vm652_vm0, %v642_v14 }
 0x152   : > { %1344 = vmatmul.mubr.msk.f32.gmra.mxu0 %vm652_vm0, %v643_v13 }
 0x206   : > { %v1336_v15 = vpop.f32.mrf.mxu0 }
 0x207   : > { %v749_v25 = vadd.f32 %v1336_v15, %v1183_v16 }
 0x208   : > { %v743_v17 = vpop.f32.mrf.mxu0 }
 0x209   : > { %v744_v22 = vadd.f32 %v1183_v16, %v743_v17 }
 0x20a   : > { %v1339_v23 = vpop.f32.mrf.mxu0 }
 0x20b   : > { %782 = vmax.xlane.f32.xlu0 %v744_v22  ;;  %v759_v37 = vadd.f32 %v1339_v23, %v1183_v16 }
 0x20c   : > { %v753_v24 = vpop.f32.mrf.mxu0 }
 0x20d   : > { %v754_v30 = vadd.f32 %v1183_v16, %v753_v24 }
 0x20e   : > { %v1342_v32 = vpop.f32.mrf.mxu0 }
 0x20f   : > { %786 = vmax.xlane.f32.xlu1 %v754_v30  ;;  %784 = vmax.xlane.f32.xlu0 %v749_v25  ;;  %v769_v47 = vadd.f32 %v1342_v32, %v1183_v16 }
 0x210   : > { %v763_v34 = vpop.f32.mrf.mxu0 }
 0x211   : > { %v764_v41 = vadd.f32 %v1183_v16, %v763_v34 }
 0x212   : > { %v1345_v43 = vpop.f32.mrf.mxu0 }
 0x213   : > { %788 = vmax.xlane.f32.xlu1 %v759_v37  ;;  %790 = vmax.xlane.f32.xlu0 %v764_v41  ;;  %v779_v52 = vadd.f32 %v1345_v43, %v1183_v16 }
 0x214   : > { %v773_v50 = vpop.f32.mrf.mxu0 }
 0x215   : > { %v774_v51 = vadd.f32 %v1183_v16, %v773_v50 }
 0x217   : > { %792 = vmax.xlane.f32.xlu1 %v769_v47  ;;  %794 = vmax.xlane.f32.xlu0 %v774_v51 }
 0x21b   : > { %796 = vmax.xlane.f32.xlu1 %v779_v52 }
 0x294   : > { %v783_v2 = vpop.xlane.xlu0 %782 }
 0x295   : > { %v798_v3 = vsub.f32 %v744_v22, %v783_v2  ;;  %v883_v2 = vld [vmem:[#allocation7 + $0xa8] sm:$0xff] }
 0x297   : > { %v806_v6 = vmul.f32 1.442695, %v798_v3  ;;  %v867_v3 = vld [vmem:[#allocation7 + $0x28] sm:$0xff] }
 0x298   : > { %v787_v8 = vpop.xlane.xlu1 %786  ;;  %v785_v9 = vpop.xlane.xlu0 %784 }
 0x299   : > { %1444 = vpow2.f32 %v806_v6  ;;  %v800_v11 = vsub.f32 %v754_v30, %v787_v8  ;;  %v799_v12 = vsub.f32 %v749_v25, %v785_v9  ;;  %v882_v6 = vld [vmem:[#allocation7 + $0xa0] sm:$0xff]  ;;  %v881_v9 = vld [vmem:[#allocation7 + $0x98] sm:$0xff] }
 0x29a   : > { %v866_v8 = vld [vmem:[#allocation7 + $0x20] sm:$0xff] }
 0x29b   : > { %v810_v13 = vmul.f32 1.442695, %v800_v11  ;;  %v808_v14 = vmul.f32 1.442695, %v799_v12  ;;  %v865_v11 = vld [vmem:[#allocation7 + $0x18] sm:$0xff]  ;;  %v880_v12 = vld [vmem:[#allocation7 + $0x90] sm:$0xff] }
 0x29c   : > { %v789_v15 = vpop.xlane.xlu1 %788  ;;  %v791_v16 = vpop.xlane.xlu0 %790 }
 0x29d   : > { %1446 = vpow2.f32 %v810_v13  ;;  %v801_v17 = vsub.f32 %v759_v37, %v789_v15  ;;  %v802_v23 = vsub.f32 %v764_v41, %v791_v16  ;;  %v864_v13 = vld [vmem:[#allocation7 + $0x10] sm:$0xff]  ;;  %v863_v15 = vld [vmem:[#allocation7 + $0x8] sm:$0xff]  ;;  %v878_v16 = vld [vmem:[#allocation7 + $0x80] sm:$0xff] }
 0x29e   : > { %1448 = vpow2.f32 %v808_v14  ;;  %v879_v14 = vld [vmem:[#allocation7 + $0x88] sm:$0xff] }
 0x29f   : > { %v812_v24 = vmul.f32 1.442695, %v801_v17  ;;  %v814_v32 = vmul.f32 1.442695, %v802_v23  ;;  %v862_v17 = vld [vmem:[#allocation7] sm:$0xff] }
 0x2a0   : > { %v793_v34 = vpop.xlane.xlu1 %792  ;;  %v795_v43 = vpop.xlane.xlu0 %794 }
 0x2a1   : > { %1450 = vpow2.f32 %v812_v24  ;;  %v803_v22 = vsub.f32 %v769_v47, %v793_v34  ;;  %v804_v50 = vsub.f32 %v774_v51, %v795_v43  ;;  %v495_v24 = vlaneseq }
 0x2a2   : > { %1452 = vpow2.f32 %v814_v32 }
 0x2a3   : > { %v816_v53 = vmul.f32 1.442695, %v803_v22  ;;  %v818_v54 = vmul.f32 1.442695, %v804_v50  ;;  %v496_v34 = vshrl.u32 %v495_v24, 7 }
 0x2a4   : > { %v797_v30 = vpop.xlane.xlu1 %796  ;;  %v492_v22 = vld [vmem:[%s440_s22] sm:$0x1]  ;;  %s1562_s22 = sshll.u32 %s1669_s12, 4  ;;  %s1563_s22 = int_to_ptr.vmem [resolvable:$false] %s1562_s22 }
 0x2a5   : > { %1454 = vpow2.f32 %v816_v53  ;;  %v805_v25 = vsub.f32 %v779_v52, %v797_v30  ;;  %v871_v52 = vld [vmem:[#allocation7 + $0x48] sm:$0xff]  ;;  %v493_v50 = vadd.f32 1.0, %v492_v22  ;;  %v497_v53 = vsub.s32 0, %v496_v34  ;;  %s1564_s18 = scalar_lea.vmem %s1563_s22, 2048  ;;  %p1565_p5 = scmp.lt.s32.totalorder %s2138_s20, %s1563_s22 }
 0x2a6   : > { %v2051_v55 = vpop.eup %1444  ;;  %1456 = vpow2.f32 %v818_v54  ;;  %1245 = vmatpush3.msra.mxu1 %v871_v52  ;;  %p1566_p13 = scmp.lt.s32.totalorder %s1564_s18, %s1558_s25 }
 0x2a7   : > { %v820_v56 = vmul.f32 1.442695, %v805_v25  ;;  %822 = vadd.xlane.f32.xlu0 %v2051_v55  ;;  %1246 = vmatprep.subr.mxu1 %v886_v57  ;;  %v468_v25 = vmul.f32 0.5, %v460_v7  ;;  %v461_v57 = vsub.f32 %v1949_v18, %v1952_v19 }
 0x2a8   : > { %1247 = vmatpush3.msra.mxu1 %v870_v59  ;;  %p1567_p0 = por %p1566_p13, %p1565_p5 }
 0x2a9   : > { %1458 = vpow2.f32 %v820_v56  ;;  %1248 = vmatprep.subr.mxu1 %v885_v61  ;;  %v2083_v56 = vrot.slane %v493_v50, %v497_v53 }
 0x2aa   : > { %v2054_v37 = vpop.eup %1446  ;;  %1249 = vmatpush3.msra.mxu1 %v869_v62  ;;  %p1568_p2 = pnand %p1567_p0, %p1561_p3 }
 0x2ab   : > { %v2056_v41 = vpop.eup %1448  ;;  %826 = vadd.xlane.f32.xlu0 %v2054_v37  ;;  %1250 = vmatprep.subr.mxu1 %v884_v0  ;;  %v500_v62 = vmul.f32 %v2083_v56, %v468_v25 }
 0x2ac   : > { %824 = vadd.xlane.f32.xlu1 %v2056_v41  ;;  %1251 = vmatpush3.msra.mxu1 %v868_v1 }
 0x2ad   : > { %1252 = vmatprep.subr.mxu1 %v883_v2  ;;  %v469_v2 = vmul.f32 0.5, %v461_v57 }
 0x2ae   : > { %v2060_v47 = vpop.eup %1450  ;;  %1253 = vmatpush3.msra.mxu1 %v867_v3 }
 0x2af   : > { %v2062_v51 = vpop.eup %1452  ;;  %1254 = vmatprep.subr.mxu1 %v882_v6  ;;  %v501_v3 = vmul.f32 %v2083_v56, %v469_v2  ;;  %v470_v6 = vmul.f32 0.5, %v462_v4 }
 0x2b0   : > { %828 = vadd.xlane.f32.xlu1 %v2060_v47  ;;  %830 = vadd.xlane.f32.xlu0 %v2062_v51 }
 0x2b1   : > { %1255 = vmatpush3.msra.mxu1 %v866_v8 }
 0x2b2   : > { %v2066_v58 = vpop.eup %1454  ;;  %1256 = vmatprep.subr.mxu1 %v881_v9 }
 0x2b3   : > { %v2068_v60 = vpop.eup %1456  ;;  %1257 = vmatpush3.msra.mxu1 %v865_v11 }
 0x2b4   : > { %832 = vadd.xlane.f32.xlu1 %v2066_v58  ;;  %834 = vadd.xlane.f32.xlu0 %v2068_v60 }
 0x2b5   : > { %1258 = vmatprep.subr.mxu1 %v880_v12  ;;  %v464_v12 = vsub.f32 %v1977_v28, %v1980_v29 }
 0x2b6   : > { %v2072_v63 = vpop.eup %1458  ;;  %1259 = vmatpush3.msra.mxu1 %v864_v13 }
 0x2b7   : > { %1260 = vmatprep.subr.mxu1 %v879_v14 }
 0x2b8   : > { %836 = vadd.xlane.f32.xlu1 %v2072_v63  ;;  %1261 = vmatpush3.msra.mxu1 %v863_v15 }
 0x2b9   : > { %1262 = vmatprep.subr.mxu1 %v878_v16 }
 0x2ba   : > { %1263 = vmatpush3.msra.mxu1 %v862_v17 }
 0x330   : > { %v823_v23 = vpop.xlane.xlu0 %822 }
 0x331   : > { %1460 = vrcp.f32 %v823_v23 }
 0x334   : > { %v827_v32 = vpop.xlane.xlu0 %826 }
 0x335   : > { %v825_v43 = vpop.xlane.xlu1 %824  ;;  %1462 = vrcp.f32 %v827_v32 }
 0x336   : > { %1464 = vrcp.f32 %v825_v43 }
 0x339   : > { %v829_v54 = vpop.xlane.xlu1 %828  ;;  %v831_v30 = vpop.xlane.xlu0 %830 }
 0x33a   : > { %1466 = vrcp.f32 %v829_v54 }
 0x33b   : > { %1468 = vrcp.f32 %v831_v30 }
 0x33d   : > { %v833_v52 = vpop.xlane.xlu1 %832  ;;  %v835_v0 = vpop.xlane.xlu0 %834 }
 0x33e   : > { %v1461_v59 = vpop.eup %1460  ;;  %1470 = vrcp.f32 %v833_v52 }
 0x33f   : > { %v846_v61 = vmul.f32 %v1461_v59, %v2051_v55  ;;  %1472 = vrcp.f32 %v835_v0 }
 0x341   : > { %v854_v1 = vmul.f32 %v846_v61, %v1924_v10  ;;  %v837_v55 = vpop.xlane.xlu1 %836  ;;  %v463_v10 = vsub.f32 %v1971_v26, %v1974_v27 }
 0x342   : > { %v1463_v5 = vpop.eup %1462  ;;  %1474 = vrcp.f32 %v837_v55 }
 0x343   : > { %v1465_v7 = vpop.eup %1464  ;;  %965 = vmatprep.mubr.f32.mxu1 %v854_v1  ;;  %v848_v19 = vmul.f32 %v1463_v5, %v2054_v37  ;;  %v502_v37 = vmul.f32 %v2083_v56, %v470_v6 }
 0x344   : > { %966 = vmatmul.mubr.f32.vlgmr.msra.gmra.mxu1 %v500_v62  ;;  %v847_v18 = vmul.f32 %v1465_v7, %v2056_v41  ;;  %v471_v41 = vmul.f32 0.5, %v463_v10 }
 0x345   : > { %v856_v20 = vmul.f32 %v848_v19, %v1989_v33  ;;  %v472_v33 = vmul.f32 0.5, %v464_v12 }
 0x346   : > { %v855_v8 = vmul.f32 %v847_v18, %v1985_v31  ;;  %v503_v13 = vmul.f32 %v2083_v56, %v471_v41 }
 0x347   : > { %v1467_v9 = vpop.eup %1466  ;;  %v504_v28 = vmul.f32 %v2083_v56, %v472_v33 }
 0x348   : > { %970 = vmatprep.mubr.f32.mxu1 %v855_v8  ;;  %v849_v21 = vmul.f32 %v1467_v9, %v2060_v47  ;;  %v1469_v11 = vpop.eup %1468  ;;  %v465_v47 = vsub.f32 %v1994_v35, %v1997_v36 }
 0x349   : > { %971 = vmatmul.mubr.f32.gmra.mxu1 %v501_v3  ;;  %v850_v27 = vmul.f32 %v1469_v11, %v2062_v51 }
 0x34a   : > { %975 = vmatprep.mubr.f32.mxu1 %v856_v20  ;;  %v857_v26 = vmul.f32 %v849_v21, %v2009_v40  ;;  %v473_v29 = vmul.f32 0.5, %v465_v47  ;;  %v466_v40 = vsub.f32 %v2003_v38, %v2006_v39 }
 0x34b   : > { %v1471_v31 = vpop.eup %1470  ;;  %v858_v14 = vmul.f32 %v850_v27, %v2014_v42  ;;  %v467_v42 = vsub.f32 %v2019_v44, %v2022_v45  ;;  %v1192_v44 = vld [vmem:[%s2242_s0] ss:$0 sm:$0xff] }
 0x34c   : > { %v851_v15 = vmul.f32 %v1471_v31, %v2066_v58  ;;  %v1473_v16 = vpop.eup %1472  ;;  %v505_v35 = vmul.f32 %v2083_v56, %v473_v29  ;;  %v474_v36 = vmul.f32 0.5, %v466_v40 }
 0x34d   : > { %976 = vmatmul.mubr.f32.gmra.mxu1 %v502_v37  ;;  %v852_v17 = vmul.f32 %v1473_v16, %v2068_v60  ;;  %v475_v39 = vmul.f32 0.5, %v467_v42 }
 0x34e   : > { %980 = vmatprep.mubr.f32.mxu1 %v857_v26  ;;  %v859_v51 = vmul.f32 %v851_v15, %v2025_v46  ;;  %v506_v38 = vmul.f32 %v2083_v56, %v474_v36 }
 0x34f   : > { %v1475_v23 = vpop.eup %1474  ;;  %v860_v58 = vmul.f32 %v852_v17, %v2030_v48  ;;  %v507_v60 = vmul.f32 %v2083_v56, %v475_v39 }
 0x350   : > { %v853_v24 = vmul.f32 %v1475_v23, %v2072_v63 }
 0x351   : > { %981 = vmatmul.mubr.f32.gmra.mxu1 %v503_v13 }
 0x352   : > { %985 = vmatprep.mubr.f32.mxu1 %v858_v14  ;;  %v861_v46 = vmul.f32 %v853_v24, %v2033_v49 }
 0x355   : > { %986 = vmatmul.mubr.f32.gmra.mxu1 %v504_v28 }
 0x356   : > { %990 = vmatprep.mubr.f32.mxu1 %v859_v51 }
 0x359   : > { %991 = vmatmul.mubr.f32.gmra.mxu1 %v505_v35 }
 0x35a   : > { %995 = vmatprep.mubr.f32.mxu1 %v860_v58 }
 0x35d   : > { %996 = vmatmul.mubr.f32.gmra.mxu1 %v506_v38 }
 0x35e   : > { %1000 = vmatprep.mubr.f32.mxu1 %v861_v46 }
 0x361   : > { %1001 = vmatmul.mubr.f32.gmra.mxu1 %v507_v60 }
 0x404   : > { %v1264_v32 = vpop.f32.mrf.mxu1 }
 0x406   : > { %v1265_v45 = vpop.f32.mrf.mxu1 }
 0x407   : > { %v1266_v48 = vadd.f32 %v1265_v45, %v1264_v32 }
 0x409   : > { %v968_v63 = vadd.f32 %v1266_v48, %v1192_v44  ;;  %v1267_v34 = vpop.f32.mrf.mxu1 }
 0x40b   : > { %1006 = vst [vmem:[%s2127_s21] sm:$0xff] %v968_v63  ;;  %v1268_v49 = vpop.f32.mrf.mxu1 }
 0x40c   : > { %v1269_v43 = vadd.f32 %v1268_v49, %v1267_v34 }
 0x40d   : > { %v1270_v22 = vpop.f32.mrf.mxu1 }
 0x40e   : > { %v973_v50 = vadd.f32 %v1269_v43, %v1192_v44 }
 0x40f   : > { %v1271_v53 = vpop.f32.mrf.mxu1 }
 0x410   : > { %1007 = vst [vmem:[%s2127_s21 + $0x8] sm:$0xff] %v973_v50  ;;  %v1272_v54 = vadd.f32 %v1271_v53, %v1270_v22 }
 0x411   : > { %v1273_v30 = vpop.f32.mrf.mxu1 }
 0x412   : > { %v978_v25 = vadd.f32 %v1272_v54, %v1192_v44 }
 0x413   : > { %v1274_v56 = vpop.f32.mrf.mxu1 }
 0x414   : > { %1008 = vst [vmem:[%s2127_s21 + $0x10] sm:$0xff] %v978_v25  ;;  %v1275_v52 = vadd.f32 %v1274_v56, %v1273_v30 }
 0x415   : > { %v1276_v57 = vpop.f32.mrf.mxu1 }
 0x416   : > { %v983_v59 = vadd.f32 %v1275_v52, %v1192_v44 }
 0x417   : > { %v1277_v61 = vpop.f32.mrf.mxu1 }
 0x418   : > { %1009 = vst [vmem:[%s2127_s21 + $0x18] sm:$0xff] %v983_v59  ;;  %v1278_v62 = vadd.f32 %v1277_v61, %v1276_v57 }
 0x419   : > { %v1279_v0 = vpop.f32.mrf.mxu1 }
 0x41a   : > { %v988_v1 = vadd.f32 %v1278_v62, %v1192_v44 }
 0x41b   : > { %v1280_v2 = vpop.f32.mrf.mxu1 }
 0x41c   : > { %1010 = vst [vmem:[%s2127_s21 + $0x20] sm:$0xff] %v988_v1  ;;  %v1281_v4 = vadd.f32 %v1280_v2, %v1279_v0 }
 0x41d   : > { %v1282_v5 = vpop.f32.mrf.mxu1 }
 0x41e   : > { %v993_v7 = vadd.f32 %v1281_v4, %v1192_v44 }
 0x41f   : > { %v1283_v18 = vpop.f32.mrf.mxu1 }
 0x420   : > { %1011 = vst [vmem:[%s2127_s21 + $0x28] sm:$0xff] %v993_v7  ;;  %v1284_v19 = vadd.f32 %v1283_v18, %v1282_v5 }
 0x421   : > { %v1285_v55 = vpop.f32.mrf.mxu1 }
 0x422   : > { %v998_v3 = vadd.f32 %v1284_v19, %v1192_v44 }
 0x423   : > { %v1286_v6 = vpop.f32.mrf.mxu1 }
 0x424   : > { %1012 = vst [vmem:[%s2127_s21 + $0x30] sm:$0xff] %v998_v3  ;;  %v1287_v10 = vadd.f32 %v1286_v6, %v1285_v55 }
 0x426   : > { %v1003_v8 = vadd.f32 %v1287_v10, %v1192_v44 }
 0x428   : > { %1013 = vst [vmem:[%s2127_s21 + $0x38] sm:$0xff] %v1003_v8 }
 0x429   : > { %1571 = shalt.err (!%p1568_p2)
}
 0x42a   : > { %s1572_s7 = scalar_lea.hbm %s2144_s17, 1024  ;;  %s1576_s8 = scalar_lea.hbm %s2245_s26, 8192 }
 0x42b   : > { %p1573_p6 = scmp.ne.s32.totalorder %s2144_s17, %s1572_s7  ;;  %p1577_p11 = scmp.lt.s32.totalorder %s2144_s17, %s2245_s26 }
 0x42c   : > { %p1578_p10 = scmp.lt.s32.totalorder %s1576_s8, %s1572_s7 }
 0x42d   : > { %p1574_p7 = pnand %p1573_p6, %p1809_p12 }
 0x42e   : > { %p1579_p1 = por %p1578_p10, %p1577_p11 }
 0x42f   : > { %p1575_p9 = pneg %p1574_p7 }
 0x431   : > { %p1580_p4 = pnand %p1579_p1, %p1575_p9 }
 0x433   : > { %1583 = shalt.err (!%p1580_p4)
}
 0x434   : > { %s1670_s23 = smov 128   ;;  %s1671_s30 = smov 8  }
 0x435   : > { %1354 = dma.vmem_to_hbm [thread:$0]  (%p1809_p12), %s2138_s20, 1024, %s2144_s17, %s1015_s24, %s1670_s23, %s1670_s23, %s1671_s30  }
 0x436 PF: > { %s2246_s13 = sld [smem:[#allocation13_spill]]  ;;  %p1374_p8 = scmp.ge.s32.totalorder %s1662_s16, 2 }
 0x437   : > { %s2247_s19 = sld [smem:[#allocation16_spill]] }
 0x43c   : > { %s1045_s25 = sand.u32 1, %s2246_s13  }
 0x43d   : > { %p2248_p3 = scmp.ne.s32.totalorder %s2247_s19, 0  ;;  %s1046_s12 = scalar_lea.sflag [#allocation4], %s1045_s25 }
 0x43f   : > { %p1368_p5 = pnand %p1374_p8, %p2248_p3 }
 0x441   : > { %p1369_p13 = pneg %p1368_p5 }
 0x443   : > { %1629 = dma.done.wait (%p1369_p13), %s1046_s12, 1024  }
 0x444   : > { %1631 = vsyncadd (%p1369_p13), %s1046_s12, 4294966272  ;;  %s28_s16 = sadd.s32 1, %s1662_s16   ;;  %s2249_s13 = sld [smem:[#allocation15_spill]] }
 0x445   : > { %p25_p0 = scmp.ge.s32.totalorder %s28_s16, 10   ;;  %s2250_s9 = sld [smem:[#allocation17_spill]] }
 0x446   : > { %s2251_s15 = sld [smem:[#allocation19_spill]]  ;;  %s2252_s30 = smov %s1638_s10 }
 0x447   : > { %s2253_s10 = smov %s1642_s11  ;;  %s2254_s11 = smov %s1829_s27 }
 0x448   : > { %s2255_s12 = smov %s1654_s14  ;;  %27 = sbr.rel (!%p25_p0) target bundleno = 14 (0xe), region = 121 }
 0x44b   : > { %s2256_s14 = smov %s2250_s9 }
 0x44d   :  { %1051 = vsyncpa [#allocation3], 1 }
 0x44e   :  { %1053 = vsyncpa [#allocation3 + $0x1], 1 }
 0x44f   :  { %1054 = vsyncpa [#allocation6], 1 }
 0x450   :  { %1056 = vsyncpa [#allocation6 + $0x1], 1 }
 0x451   :  { %1057 = vsyncpa [#allocation4], 1 }
 0x452   :  { %1059 = vsyncpa [#allocation4 + $0x1], 1 }

// kernel: tpu_custom_call.1
= control target key start
LH: loop header
LB: loop body
LE: loop exit
PB: predicated region body
PF: predicated region fallthrough
CT: control target
= control target key end

     0   :  { %s2198_s0 = inlined_call_operand.vmem [shape: f32[2,1,128], index: 0, kind: input, shape index: {}]   ;;  %s2199_s1 = inlined_call_operand.hbm [shape: f32[2,256,128], index: 1, kind: input, shape index: {}]   ;;  %s2200_s2 = inlined_call_operand.hbm [shape: f32[2,256,128], index: 2, kind: input, shape index: {}]   ;;  %s2201_s3 = inlined_call_operand.vmem [shape: f32[128,8], index: 3, kind: input, shape index: {}]   ;;  %s2202_s4 = inlined_call_operand.vmem [shape: f32[1,8], index: 4, kind: input, shape index: {}]   ;;  %s2203_s5 = inlined_call_operand.vmem [shape: f32[8,128], index: 5, kind: input, shape index: {}]   ;;  %s2204_s6 = inlined_call_operand.vmem [shape: f32[1,128], index: 6, kind: input, shape index: {}]   ;;  %s2205_s7 = inlined_call_operand.hbm [shape: f32[256,128], index: 7, kind: input, shape index: {}]   ;;  %s2206_s8 = inlined_call_operand.vmem [shape: f32[1,128], index: 8, kind: input, shape index: {}]   ;;  %s2207_s9 = inlined_call_operand.hbm [shape: f32[2,256,128], index: 9, kind: output, shape index: {}]  }
   0x1   :  { %2220 = sst [smem:[#allocation20_spill]] %s2198_s0 }
   0x2   :  { %2221 = sst [smem:[#allocation21_spill]] %s2205_s7 }
   0x3   :  { %2222 = sst [smem:[#allocation22_spill]] %s2206_s8 }
   0x4   :  { %2223 = sst [smem:[#allocation23_spill]] %s2207_s9 }
   0x5   :  { %14 = vsyncpa [#allocation3], 0 }
   0x6   :  { %16 = vsyncpa [#allocation3 + $0x1], 0 }
   0x7   :  { %17 = vsyncpa [#allocation6], 0 }
   0x8   :  { %19 = vsyncpa [#allocation6 + $0x1], 0 }
   0x9   :  { %20 = vsyncpa [#allocation4], 0 }
   0xa   :  { %22 = vsyncpa [#allocation4 + $0x1], 0  ;;  %s1722_s30 = smov 0   ;;  %s1724_s10 = smov 0  }
   0xb   :  { %s1726_s11 = smov 0   ;;  %s1728_s12 = smov 0  }
   0xc   :  { %s1730_s13 = smov 0   ;;  %s1732_s14 = smov 0  }
   0xd   :  { %s1734_s15 = smov 0   ;;  %s1736_s16 = smov 0  }
   0xe LB: > { %2224 = sst [smem:[#allocation13_spill]] %s1634_s30  ;;  %s1763_s17 = sadd.s32 4294967295, %s1662_s16   ;;  %s1662_s16 = sphi %s1736_s16, %s28_s16   ;;  %s1658_s15 = sphi %s1734_s15, %s2251_s15   ;;  %s1654_s14 = sphi %s1732_s14, %s2256_s14   ;;  %s1650_s13 = sphi %s1730_s13, %s2249_s13   ;;  %s1646_s12 = sphi %s1728_s12, %s2255_s12   ;;  %s1642_s11 = sphi %s1726_s11, %s2254_s11   ;;  %s1638_s10 = sphi %s1724_s10, %s2253_s10   ;;  %s1634_s30 = sphi %s1722_s30, %s2252_s30  }
   0xf   : > { %2225 = sst [smem:[#allocation14_spill]] %s1646_s12  ;;  %s1165_s18 = sadd.s32 4294967294, %s1662_s16  }
  0x10   : > { %2226 = sst [smem:[#allocation15_spill]] %s1658_s15  ;;  %p88_p0 = scmp.ne.s32.totalorder %s1638_s10, %s1634_s30 }
  0x11   : > { %p89_p1 = scmp.eq.s32.totalorder %s1763_s17, 0  ;;  %p274_p3 = scmp.eq.s32.totalorder %s1165_s18, 7 }
  0x12   : > { %p1166_p5 = scmp.ge.s32.totalorder %s1662_s16, 1  ;;  %p281_p7 = scmp.lt.s32.totalorder %s1662_s16, 9 }
  0x13   : > { %p1772_p4 = por %p89_p1, %p88_p0  ;;  %p1777_p6 = por %p274_p3, %p88_p0 }
  0x14   : > { %p1782_p8 = pnand %p1166_p5, %p281_p7  ;;  %s1664_s22 = smov [#allocation7]  }
  0x15   : > { %s2228_s20 = scalar_select %p1777_p6, 1, 0 }
  0x16   : > { %s305_s23 = sshll.u32 %s1664_s22, 4  ;;  %p1356_p9 = pneg %p1782_p8  ;;  %s306_s23 = int_to_ptr.vmem [resolvable:$true] %s305_s23 }
  0x17   : > { %2229 = sst [smem:[#allocation16_spill]] %s2228_s20  ;;  %s1487_s24 = scalar_lea.vmem %s306_s23, 4096 }
  0x18   : > { %p1357_p10 = pnand %p1356_p9, %p89_p1  ;;  %p1488_p12 = scmp.ne.s32.totalorder %s306_s23, %s1487_s24 }
  0x19   : > { %p1495_p3 = scmp.lt.s32.totalorder %s306_s23, %s306_s23  ;;  %p1496_p2 = scmp.lt.s32.totalorder %s1487_s24, %s1487_s24 }
  0x1a   : > { %p1478_p11 = pneg %p1357_p10 }
  0x1b   : > { %p1497_p6 = por %p1496_p2, %p1495_p3 }
  0x1c   : > { %p1490_p13 = pnand %p1488_p12, %p1478_p11 }
  0x1e   : > { %p1491_p0 = pneg %p1490_p13 }
  0x20   : > { %p1498_p5 = pnand %p1497_p6, %p1491_p0 }
  0x22   : > { %1501 = shalt.err (!%p1498_p5)
}
  0x23   : > { %s2208_s25 = smov 128   ;;  %s2210_s26 = smov 8  }
  0x24   : > { %s2231_s7 = sld [smem:[#allocation21_spill]]  ;;  %s37_s29 = sadd.s32 1, %s1654_s14 }
  0x25   : > { %p38_p2 = scmp.ge.s32.totalorder %s37_s29, 4  ;;  %s40_s18 = sadd.s32 1, %s1658_s15 }
  0x26   : > { %s75_s22 = sadd.s32 1, %s1642_s11  ;;  %p82_p6 = scmp.ne.s32.totalorder %s1642_s11, %s1638_s10 }
  0x27   : > { %s2258_s29 = smov (%p38_p2, %s37_s29), 0  ;;  %s2260_s18 = smov (!%p38_p2, %s40_s18), %s1658_s15 }
  0x28   : > { %2232 = sst [smem:[#allocation17_spill]] %s2258_s29  ;;  %s71_s24 = ssub.s32 %s1654_s14, %s2258_s29 }
  0x29   : > { %p83_p7 = scmp.eq.s32.totalorder %s1662_s16, 0  ;;  %p42_p9 = scmp.ge.s32.totalorder %s2260_s18, 2 }
  0x2a   : > { %1359 = dma.hbm_to_vmem [thread:$0]  (!%p1357_p10), %s2231_s7, 4096, %s306_s23, [#allocation6], %s2208_s25, %s2208_s25, %s2210_s26  }
  0x2b   : > { %p2233_p11 = scmp.eq.s32.totalorder %s1763_s17, 7  ;;  %p1813_p10 = por %p83_p7, %p82_p6 }
  0x2c   : > { %p1372_p13 = scmp.lt.s32.totalorder %s1662_s16, 8  ;;  %s2262_s18 = smov (%p42_p9, %s2260_s18), 0 }
  0x2d   : > { %p1809_p12 = por %p2233_p11, %p82_p6  ;;  %2237 = sst [smem:[#allocation19_spill]] %s2262_s18 }
  0x2e   : > { %s328_s28 = sand.u32 1, %s1642_s11   ;;  %s1170_s25 = sshll.u32 %s1654_s14, 3 }
  0x2f   : > { %s2234_s27 = scalar_select %p1809_p12, 1, 0 }
  0x30   : > { %s70_s26 = ssub.s32 %s1658_s15, %s2262_s18  ;;  %s1824_s29 = sshll.u32 %s328_s28, 6 }
  0x31   : > { %2235 = sst [smem:[#allocation18_spill]] %s2234_s27  ;;  %s72_s7 = sor.u32 %s71_s24, %s70_s26 }
  0x32   : > { %p73_p0 = scmp.eq.s32.totalorder %s72_s7, 0  ;;  %s1171_s20 = sshll.u32 %s1658_s15, 5 }
  0x33   : > { %s332_s30 = scalar_lea.vmem [#allocation2], %s1824_s29  ;;  %s338_s12 = sadd.s32 %s1171_s20, %s1170_s25 }
  0x34   : > { %s341_s9 = sshll.u32 %s332_s30, 4  ;;  %s1172_s8 = sshll.u32 %s338_s12, 7  ;;  %s342_s9 = int_to_ptr.vmem [resolvable:$true] %s341_s9 }
  0x35   : > { %s1829_s27 = scalar_select %p73_p0, %s1642_s11, %s75_s22  }
  0x36   : > { %p1835_p3 = pnand %p1372_p13, %p1813_p10  ;;  %s340_s7 = scalar_lea.hbm %s2199_s1, %s1172_s8 }
  0x37   : > { %s1845_s30 = scalar_lea.hbm %s2200_s2, %s1172_s8  ;;  %s329_s20 = scalar_lea.sflag [#allocation3], %s328_s28 }
  0x38   : > { %p1504_p5 = pneg %p1835_p3  ;;  %s1515_s12 = scalar_lea.vmem %s342_s9, 1024 }
  0x39   : > { %p1516_p2 = scmp.ne.s32.totalorder %s342_s9, %s1515_s12  ;;  %s1667_s25 = smov [#allocation2]  }
  0x3a   : > { %s1520_s22 = sshll.u32 %s1667_s25, 4  ;;  %s1521_s22 = int_to_ptr.vmem [resolvable:$false] %s1520_s22 }
  0x3b   : > { %p1518_p6 = pnand %p1516_p2, %p1504_p5  ;;  %s1522_s18 = scalar_lea.vmem %s1521_s22, 2048 }
  0x3c   : > { %p1523_p9 = scmp.lt.s32.totalorder %s342_s9, %s1521_s22  ;;  %p1524_p11 = scmp.lt.s32.totalorder %s1522_s18, %s1515_s12 }
  0x3d   : > { %p1519_p7 = pneg %p1518_p6 }
  0x3e   : > { %p1525_p10 = por %p1524_p11, %p1523_p9 }
  0x40   : > { %p1526_p13 = pnand %p1525_p10, %p1519_p7 }
  0x42   : > { %1529 = shalt.err (!%p1526_p13)
}
  0x43   : > { %s2239_s8 = smov 8   ;;  %s2240_s15 = smov 128  }
  0x44   : > { %1363 = dma.hbm_to_vmem [thread:$0]  (!%p1835_p3), %s340_s7, 1024, %s342_s9, %s329_s20, %s2240_s15, %s2240_s15, %s2239_s8  }
  0x45   : > { %s355_s23 = scalar_lea.vmem [#allocation5], %s1824_s29  ;;  %s351_s26 = sand.u32 1, %s1662_s16  }
  0x46   : > { %s364_s28 = sshll.u32 %s355_s23, 4  ;;  %s352_s24 = scalar_lea.sflag [#allocation6], %s351_s26  ;;  %s365_s28 = int_to_ptr.vmem [resolvable:$true] %s364_s28 }
  0x47   : > { %s1543_s25 = scalar_lea.vmem %s365_s28, 1024  ;;  %s1668_s12 = smov [#allocation5]  }
  0x48   : > { %p1544_p0 = scmp.ne.s32.totalorder %s365_s28, %s1543_s25  ;;  %s1548_s22 = sshll.u32 %s1668_s12, 4  ;;  %s1549_s22 = int_to_ptr.vmem [resolvable:$false] %s1548_s22 }
  0x49   : > { %s1550_s18 = scalar_lea.vmem %s1549_s22, 2048  ;;  %p1551_p7 = scmp.lt.s32.totalorder %s365_s28, %s1549_s22 }
  0x4a   : > { %p1546_p2 = pnand %p1544_p0, %p1504_p5  ;;  %p1552_p9 = scmp.lt.s32.totalorder %s1550_s18, %s1543_s25 }
  0x4c   : > { %p1547_p6 = pneg %p1546_p2  ;;  %p1553_p11 = por %p1552_p9, %p1551_p7 }
  0x4e   : > { %p1554_p10 = pnand %p1553_p11, %p1547_p6 }
  0x50   : > { %1557 = shalt.err (!%p1554_p10)
}
  0x51   : > { %1366 = dma.hbm_to_vmem [thread:$0]  (!%p1835_p3), %s1845_s30, 1024, %s365_s28, %s352_s24, %s2240_s15, %s2240_s15, %s2239_s8  }
  0x52   : > { %376 = sbr.rel (%p1782_p8) target bundleno = 1078 (0x436), region = 56  ;;  %s1871_s9 = sand.u32 (!%p1782_p8), 1, %s1638_s10  }
  0x53   : > { %s1874_s29 = sshll.u32 (!%p1782_p8), %s1871_s9, 6  ;;  %s379_s7 = scalar_lea.sflag (!%p1782_p8), [#allocation3], %s1871_s9 }
  0x54   : > { %s1878_s20 = scalar_lea.vmem (!%p1782_p8), [#allocation2], %s1874_s29 }
  0x57   : > { %1617 = dma.done.wait (%p1772_p4), %s379_s7, 1024  }
  0x58   : > { %1619 = vsyncadd (%p1772_p4), %s379_s7, 4294966272  ;;  %s387_s0 = sand.u32 1, %s1763_s17   ;;  %s1886_s30 = scalar_lea.vmem [#allocation5], %s1874_s29 }
  0x59   : > { %s388_s21 = scalar_lea.sflag [#allocation6], %s387_s0 }
  0x5a   : > { %1621 = dma.done.wait (%p1772_p4), %s388_s21, 1024  }
  0x5b   : > { %1623 = vsyncadd (%p1772_p4), %s388_s21, 4294966272 }
  0x5c   : > { %1625 = dma.done.wait (%p89_p1), [#allocation6], 4096  }
  0x5d   : > { %1627 = vsyncadd (%p89_p1), [#allocation6], 4294963200  ;;  %v523_v0 = vld [vmem:[%s2201_s3 + $0x78] sm:$0xff]  ;;  %v522_v1 = vld [vmem:[%s2201_s3 + $0x70] sm:$0xff]  ;;  %vm652_vm0 = vcmask 64512   ;;  %p438_p1 = scmp.lt.s32.totalorder %s1650_s13, 1 }
  0x5e   : > { %1288 = vmatprep.subr.mxu0 %v523_v0  ;;  %v521_v2 = vld [vmem:[%s2201_s3 + $0x68] sm:$0xff]  ;;  %v520_v3 = vld [vmem:[%s2201_s3 + $0x60] sm:$0xff]  ;;  %v519_v6 = vld [vmem:[%s2201_s3 + $0x58] sm:$0xff]  ;;  %s2241_s12 = sld [smem:[#allocation20_spill]]  ;;  %s2127_s21 = scalar_lea.vmem [#allocation8], %s1874_s29 }
  0x5f   : > { %1289 = vmatpush3.msra.mxu0 %v523_v0  ;;  %v1909_v4 = vld [vmem:[%s1878_s20] sm:$0xff]  ;;  %v518_v9 = vld [vmem:[%s2201_s3 + $0x50] sm:$0xff]  ;;  %v517_v11 = vld [vmem:[%s2201_s3 + $0x48] sm:$0xff]  ;;  %s439_s17 = scalar_select %p438_p1, %s1650_s13, 1 }
  0x60   : > { %1290 = vmatprep.subr.mxu0 %v522_v1  ;;  %v1912_v5 = vld [vmem:[%s1886_s30] sm:$0xff]  ;;  %v515_v13 = vld [vmem:[%s2201_s3 + $0x38] sm:$0xff]  ;;  %v514_v14 = vld [vmem:[%s2201_s3 + $0x30] sm:$0xff]  ;;  %s2242_s0 = sld [smem:[#allocation22_spill]]  ;;  %s1195_s15 = sshll.u32 %s1650_s13, 5 }
  0x61   : > { %1291 = vmatpush3.msra.mxu0 %v522_v1  ;;  %v460_v7 = vsub.f32 %v1909_v4, %v1912_v5  ;;  %v476_v8 = vadd.f32 %v1912_v5, %v1909_v4  ;;  %v516_v12 = vld [vmem:[%s2201_s3 + $0x40] sm:$0xff]  ;;  %v513_v15 = vld [vmem:[%s2201_s3 + $0x28] sm:$0xff]  ;;  %v511_v17 = vld [vmem:[%s2201_s3 + $0x18] sm:$0xff]  ;;  %s2243_s8 = sld [smem:[#allocation14_spill]]  ;;  %s1015_s24 = scalar_lea.sflag [#allocation4], %s1871_s9 }
  0x62   : > { %1292 = vmatprep.subr.mxu0 %v521_v2  ;;  %v512_v16 = vld [vmem:[%s2201_s3 + $0x20] sm:$0xff]  ;;  %v1949_v18 = vld [vmem:[%s1878_s20 + $0x8] sm:$0xff]  ;;  %v1955_v20 = vld [vmem:[%s1878_s20 + $0x10] sm:$0xff]  ;;  %s2245_s26 = sld [smem:[#allocation23_spill]] }
  0x63   : > { %1293 = vmatpush3.msra.mxu0 %v521_v2  ;;  %v1924_v10 = vmul.f32 0.5, %v476_v8  ;;  %v1952_v19 = vld [vmem:[%s1886_s30 + $0x8] sm:$0xff]  ;;  %v1958_v21 = vld [vmem:[%s1886_s30 + $0x10] sm:$0xff]  ;;  %v1971_v26 = vld [vmem:[%s1878_s20 + $0x18] sm:$0xff] }
  0x64   : > { %1294 = vmatprep.subr.mxu0 %v520_v3  ;;  %v510_v22 = vld [vmem:[%s2201_s3 + $0x10] sm:$0xff]  ;;  %v477_v23 = vadd.f32 %v1952_v19, %v1949_v18  ;;  %v509_v24 = vld [vmem:[%s2201_s3 + $0x8] sm:$0xff]  ;;  %v478_v25 = vadd.f32 %v1958_v21, %v1955_v20  ;;  %v1974_v27 = vld [vmem:[%s1886_s30 + $0x18] sm:$0xff]  ;;  %s440_s22 = scalar_lea.vmem %s2241_s12, %s439_s17  ;;  %v462_v4 = vsub.f32 %v1955_v20, %v1958_v21  ;;  %s1669_s12 = smov [#allocation8]  }
  0x65   : > { %1295 = vmatpush3.msra.mxu0 %v520_v3  ;;  %1320 = vmatprep.mubr.f32.mxu0 %v1924_v10  ;;  %v1977_v28 = vld [vmem:[%s1878_s20 + $0x20] sm:$0xff]  ;;  %v479_v32 = vadd.f32 %v1974_v27, %v1971_v26  ;;  %v1994_v35 = vld [vmem:[%s1878_s20 + $0x28] sm:$0xff]  ;;  %v2003_v38 = vld [vmem:[%s1878_s20 + $0x30] sm:$0xff] }
  0x66   : > { %1296 = vmatprep.subr.mxu0 %v519_v6  ;;  %v1980_v29 = vld [vmem:[%s1886_s30 + $0x20] sm:$0xff]  ;;  %v1985_v31 = vmul.f32 0.5, %v477_v23  ;;  %v1989_v33 = vmul.f32 0.5, %v478_v25  ;;  %v1997_v36 = vld [vmem:[%s1886_s30 + $0x28] sm:$0xff]  ;;  %v2006_v39 = vld [vmem:[%s1886_s30 + $0x30] sm:$0xff] }
  0x67   : > { %1297 = vmatpush3.msra.mxu0 %v519_v6  ;;  %v508_v30 = vld [vmem:[%s2201_s3] sm:$0xff]  ;;  %v480_v34 = vadd.f32 %v1980_v29, %v1977_v28  ;;  %v2009_v40 = vmul.f32 0.5, %v479_v32  ;;  %v481_v41 = vadd.f32 %v1997_v36, %v1994_v35  ;;  %v482_v43 = vadd.f32 %v2006_v39, %v2003_v38  ;;  %v2019_v44 = vld [vmem:[%s1878_s20 + $0x38] sm:$0xff]  ;;  %s1194_s29 = sshll.u32 %s2243_s8, 3  ;;  %s1030_s20 = sshll.u32 %s2127_s21, 4  ;;  %s2138_s20 = int_to_ptr.vmem [resolvable:$true] %s1030_s20 }
  0x68   : > { %1298 = vmatprep.subr.mxu0 %v518_v9  ;;  %v644_v37 = vld [vmem:[%s2203_s5] sm:$0xff]  ;;  %v2022_v45 = vld [vmem:[%s1886_s30 + $0x38] sm:$0xff]  ;;  %s1027_s23 = sadd.s32 %s1195_s15, %s1194_s29  ;;  %s1558_s25 = scalar_lea.vmem %s2138_s20, 1024 }
  0x69   : > { %1299 = vmatpush3.msra.mxu0 %v518_v9  ;;  %v2014_v42 = vmul.f32 0.5, %v480_v34  ;;  %v2025_v46 = vmul.f32 0.5, %v481_v41  ;;  %v483_v47 = vadd.f32 %v2022_v45, %v2019_v44  ;;  %v2030_v48 = vmul.f32 0.5, %v482_v43  ;;  %v1182_v50 = vld [vmem:[%s2202_s4] ss:$0 sm:$0xff]  ;;  %s1196_s30 = sshll.u32 %s1027_s23, 7  ;;  %p1559_p4 = scmp.ne.s32.totalorder %s2138_s20, %s1558_s25 }
  0x6a   : > { %1300 = vmatprep.subr.mxu0 %v517_v11  ;;  %s2144_s17 = scalar_lea.hbm %s2245_s26, %s1196_s30 }
  0x6b   : > { %1301 = vmatpush3.msra.mxu0 %v517_v11  ;;  %v2033_v49 = vmul.f32 0.5, %v483_v47  ;;  %p1560_p8 = pnand %p1559_p4, %p1809_p12 }
  0x6c   : > { %1302 = vmatprep.subr.mxu0 %v516_v12 }
  0x6d   : > { %1303 = vmatpush3.msra.mxu0 %v516_v12  ;;  %p1561_p3 = pneg %p1560_p8 }
  0x6e   : > { %1304 = vmatprep.subr.mxu0 %v515_v13 }
  0x6f   : > { %1305 = vmatpush3.msra.mxu0 %v515_v13 }
  0x70   : > { %1306 = vmatprep.subr.mxu0 %v514_v14 }
  0x71   : > { %1307 = vmatpush3.msra.mxu0 %v514_v14 }
  0x72   : > { %1308 = vmatprep.subr.mxu0 %v513_v15 }
  0x73   : > { %1309 = vmatpush3.msra.mxu0 %v513_v15 }
  0x74   : > { %1310 = vmatprep.subr.mxu0 %v512_v16 }
  0x75   : > { %1311 = vmatpush3.msra.mxu0 %v512_v16  ;;  %v1183_v16 = vld [vmem:[%s2204_s6] ss:$0 sm:$0xff] }
  0x76   : > { %1312 = vmatprep.subr.mxu0 %v511_v17 }
  0x77   : > { %1313 = vmatpush3.msra.mxu0 %v511_v17 }
  0x78   : > { %1314 = vmatprep.subr.mxu0 %v510_v22 }
  0x79   : > { %1315 = vmatpush3.msra.mxu0 %v510_v22 }
  0x7a   : > { %1316 = vmatprep.subr.mxu0 %v509_v24 }
  0x7b   : > { %1317 = vmatpush3.msra.mxu0 %v509_v24 }
  0x7c   : > { %1318 = vmatprep.subr.mxu0 %v508_v30 }
  0x7d   : > { %1319 = vmatpush3.msra.mxu0 %v508_v30 }
  0x7e   : > { %1321 = vmatmul.mubr.f32.vlgmr.msra.gmra.mxu0 %v1985_v31  ;;  %1332 = vmatprep.subr.mxu0 %v644_v37 }
  0x7f   : > { %1323 = vmatprep.mubr.f32.mxu0 %v1989_v33  ;;  %1333 = vmatpush3.msra.mxu0 %v644_v37 }
  0x82   : > { %1324 = vmatmul.mubr.f32.gmra.mxu0 %v2009_v40 }
  0x83   : > { %1326 = vmatprep.mubr.f32.mxu0 %v2014_v42 }
  0x86   : > { %1327 = vmatmul.mubr.f32.gmra.mxu0 %v2025_v46 }
  0x87   : > { %1329 = vmatprep.mubr.f32.mxu0 %v2030_v48 }
  0x8a   : > { %1330 = vmatmul.mubr.f32.gmra.mxu0 %v2033_v49 }
 0x13e   : > { %v1322_v51 = vpop.f32.mrf.mxu0 }
 0x13f   : > { %v603_v52 = vadd.f32 %v1322_v51, %v1182_v50 }
 0x140   : > { %v597_v53 = vpop.f32.mrf.mxu0 }
 0x141   : > { %v598_v54 = vadd.f32 %v1182_v50, %v597_v53  ;;  %v637_v58 = vmax.f32 %v603_v52, 0.0  ;;  %v893_v53 = vld [vmem:[#allocation7 + $0xf8] sm:$0xff] }
 0x142   : > { %v1325_v55 = vpop.f32.mrf.mxu0  ;;  %1232 = vmatprep.subr.mxu1 %v893_v53 }
 0x143   : > { %v636_v56 = vmax.f32 %v598_v54, 0.0  ;;  %v613_v57 = vadd.f32 %v1325_v55, %v1182_v50  ;;  %v877_v54 = vld [vmem:[#allocation7 + $0x78] sm:$0xff]  ;;  %v892_v55 = vld [vmem:[#allocation7 + $0xf0] sm:$0xff] }
 0x144   : > { %v607_v59 = vpop.f32.mrf.mxu0  ;;  %1233 = vmatpush3.msra.mxu1 %v877_v54 }
 0x145   : > { %v608_v60 = vadd.f32 %v1182_v50, %v607_v59  ;;  %1334 = vmatprep.mubr.msk.f32.mxu0 %vm652_vm0, %v636_v56  ;;  %v639_v61 = vmax.f32 %v613_v57, 0.0  ;;  %v876_v56 = vld [vmem:[#allocation7 + $0x70] sm:$0xff]  ;;  %v891_v57 = vld [vmem:[#allocation7 + $0xe8] sm:$0xff]  ;;  %1234 = vmatprep.subr.mxu1 %v892_v55  ;;  %v890_v59 = vld [vmem:[#allocation7 + $0xe0] sm:$0xff] }
 0x146   : > { %v1328_v62 = vpop.f32.mrf.mxu0  ;;  %1335 = vmatmul.mubr.msk.f32.vlgmr.msra.gmra.mxu0 %vm652_vm0, %v637_v58  ;;  %v875_v58 = vld [vmem:[#allocation7 + $0x68] sm:$0xff]  ;;  %1235 = vmatpush3.msra.mxu1 %v876_v56 }
 0x147   : > { %v638_v63 = vmax.f32 %v608_v60, 0.0  ;;  %v623_v0 = vadd.f32 %v1328_v62, %v1182_v50  ;;  %1236 = vmatprep.subr.mxu1 %v891_v57  ;;  %v874_v60 = vld [vmem:[#allocation7 + $0x60] sm:$0xff]  ;;  %v873_v62 = vld [vmem:[#allocation7 + $0x58] sm:$0xff] }
 0x148   : > { %v617_v1 = vpop.f32.mrf.mxu0  ;;  %1237 = vmatpush3.msra.mxu1 %v875_v58  ;;  %v886_v57 = vld [vmem:[#allocation7 + $0xc0] sm:$0xff] }
 0x149   : > { %v618_v2 = vadd.f32 %v1182_v50, %v617_v1  ;;  %1337 = vmatprep.mubr.msk.f32.mxu0 %vm652_vm0, %v638_v63  ;;  %v641_v3 = vmax.f32 %v623_v0, 0.0  ;;  %1238 = vmatprep.subr.mxu1 %v890_v59  ;;  %v888_v63 = vld [vmem:[#allocation7 + $0xd0] sm:$0xff]  ;;  %v887_v1 = vld [vmem:[#allocation7 + $0xc8] sm:$0xff]  ;;  %v870_v59 = vld [vmem:[#allocation7 + $0x40] sm:$0xff] }
 0x14a   : > { %v1331_v6 = vpop.f32.mrf.mxu0  ;;  %1338 = vmatmul.mubr.msk.f32.gmra.mxu0 %vm652_vm0, %v639_v61  ;;  %v889_v61 = vld [vmem:[#allocation7 + $0xd8] sm:$0xff]  ;;  %1239 = vmatpush3.msra.mxu1 %v874_v60  ;;  %v872_v0 = vld [vmem:[#allocation7 + $0x50] sm:$0xff] }
 0x14b   : > { %v640_v8 = vmax.f32 %v618_v2, 0.0  ;;  %v633_v9 = vadd.f32 %v1331_v6, %v1182_v50  ;;  %1240 = vmatprep.subr.mxu1 %v889_v61  ;;  %v885_v61 = vld [vmem:[#allocation7 + $0xb8] sm:$0xff] }
 0x14c   : > { %v627_v11 = vpop.f32.mrf.mxu0  ;;  %1241 = vmatpush3.msra.mxu1 %v873_v62  ;;  %v869_v62 = vld [vmem:[#allocation7 + $0x38] sm:$0xff] }
 0x14d   : > { %v628_v12 = vadd.f32 %v1182_v50, %v627_v11  ;;  %1340 = vmatprep.mubr.msk.f32.mxu0 %vm652_vm0, %v640_v8  ;;  %v643_v13 = vmax.f32 %v633_v9, 0.0  ;;  %1242 = vmatprep.subr.mxu1 %v888_v63 }
 0x14e   : > { %1341 = vmatmul.mubr.msk.f32.gmra.mxu0 %vm652_vm0, %v641_v3  ;;  %1243 = vmatpush3.msra.mxu1 %v872_v0  ;;  %v884_v0 = vld [vmem:[#allocation7 + $0xb0] sm:$0xff] }
 0x14f   : > { %v642_v14 = vmax.f32 %v628_v12, 0.0  ;;  %1244 = vmatprep.subr.mxu1 %v887_v1  ;;  %v868_v1 = vld [vmem:[#allocation7 + $0x30] sm:$0xff] }
 0x151   : > { %1343 = vmatprep.mubr.msk.f32.mxu0 %vm652_vm0, %v642_v14 }
 0x152   : > { %1344 = vmatmul.mubr.msk.f32.gmra.mxu0 %vm652_vm0, %v643_v13 }
 0x206   : > { %v1336_v15 = vpop.f32.mrf.mxu0 }
 0x207   : > { %v749_v25 = vadd.f32 %v1336_v15, %v1183_v16 }
 0x208   : > { %v743_v17 = vpop.f32.mrf.mxu0 }
 0x209   : > { %v744_v22 = vadd.f32 %v1183_v16, %v743_v17 }
 0x20a   : > { %v1339_v23 = vpop.f32.mrf.mxu0 }
 0x20b   : > { %782 = vmax.xlane.f32.xlu0 %v744_v22  ;;  %v759_v37 = vadd.f32 %v1339_v23, %v1183_v16 }
 0x20c   : > { %v753_v24 = vpop.f32.mrf.mxu0 }
 0x20d   : > { %v754_v30 = vadd.f32 %v1183_v16, %v753_v24 }
 0x20e   : > { %v1342_v32 = vpop.f32.mrf.mxu0 }
 0x20f   : > { %786 = vmax.xlane.f32.xlu1 %v754_v30  ;;  %784 = vmax.xlane.f32.xlu0 %v749_v25  ;;  %v769_v47 = vadd.f32 %v1342_v32, %v1183_v16 }
 0x210   : > { %v763_v34 = vpop.f32.mrf.mxu0 }
 0x211   : > { %v764_v41 = vadd.f32 %v1183_v16, %v763_v34 }
 0x212   : > { %v1345_v43 = vpop.f32.mrf.mxu0 }
 0x213   : > { %788 = vmax.xlane.f32.xlu1 %v759_v37  ;;  %790 = vmax.xlane.f32.xlu0 %v764_v41  ;;  %v779_v52 = vadd.f32 %v1345_v43, %v1183_v16 }
 0x214   : > { %v773_v50 = vpop.f32.mrf.mxu0 }
 0x215   : > { %v774_v51 = vadd.f32 %v1183_v16, %v773_v50 }
 0x217   : > { %792 = vmax.xlane.f32.xlu1 %v769_v47  ;;  %794 = vmax.xlane.f32.xlu0 %v774_v51 }
 0x21b   : > { %796 = vmax.xlane.f32.xlu1 %v779_v52 }
 0x294   : > { %v783_v2 = vpop.xlane.xlu0 %782 }
 0x295   : > { %v798_v3 = vsub.f32 %v744_v22, %v783_v2  ;;  %v883_v2 = vld [vmem:[#allocation7 + $0xa8] sm:$0xff] }
 0x297   : > { %v806_v6 = vmul.f32 1.442695, %v798_v3  ;;  %v867_v3 = vld [vmem:[#allocation7 + $0x28] sm:$0xff] }
 0x298   : > { %v787_v8 = vpop.xlane.xlu1 %786  ;;  %v785_v9 = vpop.xlane.xlu0 %784 }
 0x299   : > { %1444 = vpow2.f32 %v806_v6  ;;  %v800_v11 = vsub.f32 %v754_v30, %v787_v8  ;;  %v799_v12 = vsub.f32 %v749_v25, %v785_v9  ;;  %v882_v6 = vld [vmem:[#allocation7 + $0xa0] sm:$0xff]  ;;  %v881_v9 = vld [vmem:[#allocation7 + $0x98] sm:$0xff] }
 0x29a   : > { %v866_v8 = vld [vmem:[#allocation7 + $0x20] sm:$0xff] }
 0x29b   : > { %v810_v13 = vmul.f32 1.442695, %v800_v11  ;;  %v808_v14 = vmul.f32 1.442695, %v799_v12  ;;  %v865_v11 = vld [vmem:[#allocation7 + $0x18] sm:$0xff]  ;;  %v880_v12 = vld [vmem:[#allocation7 + $0x90] sm:$0xff] }
 0x29c   : > { %v789_v15 = vpop.xlane.xlu1 %788  ;;  %v791_v16 = vpop.xlane.xlu0 %790 }
 0x29d   : > { %1446 = vpow2.f32 %v810_v13  ;;  %v801_v17 = vsub.f32 %v759_v37, %v789_v15  ;;  %v802_v23 = vsub.f32 %v764_v41, %v791_v16  ;;  %v864_v13 = vld [vmem:[#allocation7 + $0x10] sm:$0xff]  ;;  %v863_v15 = vld [vmem:[#allocation7 + $0x8] sm:$0xff]  ;;  %v878_v16 = vld [vmem:[#allocation7 + $0x80] sm:$0xff] }
 0x29e   : > { %1448 = vpow2.f32 %v808_v14  ;;  %v879_v14 = vld [vmem:[#allocation7 + $0x88] sm:$0xff] }
 0x29f   : > { %v812_v24 = vmul.f32 1.442695, %v801_v17  ;;  %v814_v32 = vmul.f32 1.442695, %v802_v23  ;;  %v862_v17 = vld [vmem:[#allocation7] sm:$0xff] }
 0x2a0   : > { %v793_v34 = vpop.xlane.xlu1 %792  ;;  %v795_v43 = vpop.xlane.xlu0 %794 }
 0x2a1   : > { %1450 = vpow2.f32 %v812_v24  ;;  %v803_v22 = vsub.f32 %v769_v47, %v793_v34  ;;  %v804_v50 = vsub.f32 %v774_v51, %v795_v43  ;;  %v495_v24 = vlaneseq }
 0x2a2   : > { %1452 = vpow2.f32 %v814_v32 }
 0x2a3   : > { %v816_v53 = vmul.f32 1.442695, %v803_v22  ;;  %v818_v54 = vmul.f32 1.442695, %v804_v50  ;;  %v496_v34 = vshrl.u32 %v495_v24, 7 }
 0x2a4   : > { %v797_v30 = vpop.xlane.xlu1 %796  ;;  %v492_v22 = vld [vmem:[%s440_s22] sm:$0x1]  ;;  %s1562_s22 = sshll.u32 %s1669_s12, 4  ;;  %s1563_s22 = int_to_ptr.vmem [resolvable:$false] %s1562_s22 }
 0x2a5   : > { %1454 = vpow2.f32 %v816_v53  ;;  %v805_v25 = vsub.f32 %v779_v52, %v797_v30  ;;  %v871_v52 = vld [vmem:[#allocation7 + $0x48] sm:$0xff]  ;;  %v493_v50 = vadd.f32 1.0, %v492_v22  ;;  %v497_v53 = vsub.s32 0, %v496_v34  ;;  %s1564_s18 = scalar_lea.vmem %s1563_s22, 2048  ;;  %p1565_p5 = scmp.lt.s32.totalorder %s2138_s20, %s1563_s22 }
 0x2a6   : > { %v2051_v55 = vpop.eup %1444  ;;  %1456 = vpow2.f32 %v818_v54  ;;  %1245 = vmatpush3.msra.mxu1 %v871_v52  ;;  %p1566_p13 = scmp.lt.s32.totalorder %s1564_s18, %s1558_s25 }
 0x2a7   : > { %v820_v56 = vmul.f32 1.442695, %v805_v25  ;;  %822 = vadd.xlane.f32.xlu0 %v2051_v55  ;;  %1246 = vmatprep.subr.mxu1 %v886_v57  ;;  %v468_v25 = vmul.f32 0.5, %v460_v7  ;;  %v461_v57 = vsub.f32 %v1949_v18, %v1952_v19 }
 0x2a8   : > { %1247 = vmatpush3.msra.mxu1 %v870_v59  ;;  %p1567_p0 = por %p1566_p13, %p1565_p5 }
 0x2a9   : > { %1458 = vpow2.f32 %v820_v56  ;;  %1248 = vmatprep.subr.mxu1 %v885_v61  ;;  %v2083_v56 = vrot.slane %v493_v50, %v497_v53 }
 0x2aa   : > { %v2054_v37 = vpop.eup %1446  ;;  %1249 = vmatpush3.msra.mxu1 %v869_v62  ;;  %p1568_p2 = pnand %p1567_p0, %p1561_p3 }
 0x2ab   : > { %v2056_v41 = vpop.eup %1448  ;;  %826 = vadd.xlane.f32.xlu0 %v2054_v37  ;;  %1250 = vmatprep.subr.mxu1 %v884_v0  ;;  %v500_v62 = vmul.f32 %v2083_v56, %v468_v25 }
 0x2ac   : > { %824 = vadd.xlane.f32.xlu1 %v2056_v41  ;;  %1251 = vmatpush3.msra.mxu1 %v868_v1 }
 0x2ad   : > { %1252 = vmatprep.subr.mxu1 %v883_v2  ;;  %v469_v2 = vmul.f32 0.5, %v461_v57 }
 0x2ae   : > { %v2060_v47 = vpop.eup %1450  ;;  %1253 = vmatpush3.msra.mxu1 %v867_v3 }
 0x2af   : > { %v2062_v51 = vpop.eup %1452  ;;  %1254 = vmatprep.subr.mxu1 %v882_v6  ;;  %v501_v3 = vmul.f32 %v2083_v56, %v469_v2  ;;  %v470_v6 = vmul.f32 0.5, %v462_v4 }
 0x2b0   : > { %828 = vadd.xlane.f32.xlu1 %v2060_v47  ;;  %830 = vadd.xlane.f32.xlu0 %v2062_v51 }
 0x2b1   : > { %1255 = vmatpush3.msra.mxu1 %v866_v8 }
 0x2b2   : > { %v2066_v58 = vpop.eup %1454  ;;  %1256 = vmatprep.subr.mxu1 %v881_v9 }
 0x2b3   : > { %v2068_v60 = vpop.eup %1456  ;;  %1257 = vmatpush3.msra.mxu1 %v865_v11 }
 0x2b4   : > { %832 = vadd.xlane.f32.xlu1 %v2066_v58  ;;  %834 = vadd.xlane.f32.xlu0 %v2068_v60 }
 0x2b5   : > { %1258 = vmatprep.subr.mxu1 %v880_v12  ;;  %v464_v12 = vsub.f32 %v1977_v28, %v1980_v29 }
 0x2b6   : > { %v2072_v63 = vpop.eup %1458  ;;  %1259 = vmatpush3.msra.mxu1 %v864_v13 }
 0x2b7   : > { %1260 = vmatprep.subr.mxu1 %v879_v14 }
 0x2b8   : > { %836 = vadd.xlane.f32.xlu1 %v2072_v63  ;;  %1261 = vmatpush3.msra.mxu1 %v863_v15 }
 0x2b9   : > { %1262 = vmatprep.subr.mxu1 %v878_v16 }
 0x2ba   : > { %1263 = vmatpush3.msra.mxu1 %v862_v17 }
 0x330   : > { %v823_v23 = vpop.xlane.xlu0 %822 }
 0x331   : > { %1460 = vrcp.f32 %v823_v23 }
 0x334   : > { %v827_v32 = vpop.xlane.xlu0 %826 }
 0x335   : > { %v825_v43 = vpop.xlane.xlu1 %824  ;;  %1462 = vrcp.f32 %v827_v32 }
 0x336   : > { %1464 = vrcp.f32 %v825_v43 }
 0x339   : > { %v829_v54 = vpop.xlane.xlu1 %828  ;;  %v831_v30 = vpop.xlane.xlu0 %830 }
 0x33a   : > { %1466 = vrcp.f32 %v829_v54 }
 0x33b   : > { %1468 = vrcp.f32 %v831_v30 }
 0x33d   : > { %v833_v52 = vpop.xlane.xlu1 %832  ;;  %v835_v0 = vpop.xlane.xlu0 %834 }
 0x33e   : > { %v1461_v59 = vpop.eup %1460  ;;  %1470 = vrcp.f32 %v833_v52 }
 0x33f   : > { %v846_v61 = vmul.f32 %v1461_v59, %v2051_v55  ;;  %1472 = vrcp.f32 %v835_v0 }
 0x341   : > { %v854_v1 = vmul.f32 %v846_v61, %v1924_v10  ;;  %v837_v55 = vpop.xlane.xlu1 %836  ;;  %v463_v10 = vsub.f32 %v1971_v26, %v1974_v27 }
 0x342   : > { %v1463_v5 = vpop.eup %1462  ;;  %1474 = vrcp.f32 %v837_v55 }
 0x343   : > { %v1465_v7 = vpop.eup %1464  ;;  %965 = vmatprep.mubr.f32.mxu1 %v854_v1  ;;  %v848_v19 = vmul.f32 %v1463_v5, %v2054_v37  ;;  %v502_v37 = vmul.f32 %v2083_v56, %v470_v6 }
 0x344   : > { %966 = vmatmul.mubr.f32.vlgmr.msra.gmra.mxu1 %v500_v62  ;;  %v847_v18 = vmul.f32 %v1465_v7, %v2056_v41  ;;  %v471_v41 = vmul.f32 0.5, %v463_v10 }
 0x345   : > { %v856_v20 = vmul.f32 %v848_v19, %v1989_v33  ;;  %v472_v33 = vmul.f32 0.5, %v464_v12 }
 0x346   : > { %v855_v8 = vmul.f32 %v847_v18, %v1985_v31  ;;  %v503_v13 = vmul.f32 %v2083_v56, %v471_v41 }
 0x347   : > { %v1467_v9 = vpop.eup %1466  ;;  %v504_v28 = vmul.f32 %v2083_v56, %v472_v33 }
 0x348   : > { %970 = vmatprep.mubr.f32.mxu1 %v855_v8  ;;  %v849_v21 = vmul.f32 %v1467_v9, %v2060_v47  ;;  %v1469_v11 = vpop.eup %1468  ;;  %v465_v47 = vsub.f32 %v1994_v35, %v1997_v36 }
 0x349   : > { %971 = vmatmul.mubr.f32.gmra.mxu1 %v501_v3  ;;  %v850_v27 = vmul.f32 %v1469_v11, %v2062_v51 }
 0x34a   : > { %975 = vmatprep.mubr.f32.mxu1 %v856_v20  ;;  %v857_v26 = vmul.f32 %v849_v21, %v2009_v40  ;;  %v473_v29 = vmul.f32 0.5, %v465_v47  ;;  %v466_v40 = vsub.f32 %v2003_v38, %v2006_v39 }
 0x34b   : > { %v1471_v31 = vpop.eup %1470  ;;  %v858_v14 = vmul.f32 %v850_v27, %v2014_v42  ;;  %v467_v42 = vsub.f32 %v2019_v44, %v2022_v45  ;;  %v1192_v44 = vld [vmem:[%s2242_s0] ss:$0 sm:$0xff] }
 0x34c   : > { %v851_v15 = vmul.f32 %v1471_v31, %v2066_v58  ;;  %v1473_v16 = vpop.eup %1472  ;;  %v505_v35 = vmul.f32 %v2083_v56, %v473_v29  ;;  %v474_v36 = vmul.f32 0.5, %v466_v40 }
 0x34d   : > { %976 = vmatmul.mubr.f32.gmra.mxu1 %v502_v37  ;;  %v852_v17 = vmul.f32 %v1473_v16, %v2068_v60  ;;  %v475_v39 = vmul.f32 0.5, %v467_v42 }
 0x34e   : > { %980 = vmatprep.mubr.f32.mxu1 %v857_v26  ;;  %v859_v51 = vmul.f32 %v851_v15, %v2025_v46  ;;  %v506_v38 = vmul.f32 %v2083_v56, %v474_v36 }
 0x34f   : > { %v1475_v23 = vpop.eup %1474  ;;  %v860_v58 = vmul.f32 %v852_v17, %v2030_v48  ;;  %v507_v60 = vmul.f32 %v2083_v56, %v475_v39 }
 0x350   : > { %v853_v24 = vmul.f32 %v1475_v23, %v2072_v63 }
 0x351   : > { %981 = vmatmul.mubr.f32.gmra.mxu1 %v503_v13 }
 0x352   : > { %985 = vmatprep.mubr.f32.mxu1 %v858_v14  ;;  %v861_v46 = vmul.f32 %v853_v24, %v2033_v49 }
 0x355   : > { %986 = vmatmul.mubr.f32.gmra.mxu1 %v504_v28 }
 0x356   : > { %990 = vmatprep.mubr.f32.mxu1 %v859_v51 }
 0x359   : > { %991 = vmatmul.mubr.f32.gmra.mxu1 %v505_v35 }
 0x35a   : > { %995 = vmatprep.mubr.f32.mxu1 %v860_v58 }
 0x35d   : > { %996 = vmatmul.mubr.f32.gmra.mxu1 %v506_v38 }
 0x35e   : > { %1000 = vmatprep.mubr.f32.mxu1 %v861_v46 }
 0x361   : > { %1001 = vmatmul.mubr.f32.gmra.mxu1 %v507_v60 }
 0x404   : > { %v1264_v32 = vpop.f32.mrf.mxu1 }
 0x406   : > { %v1265_v45 = vpop.f32.mrf.mxu1 }
 0x407   : > { %v1266_v48 = vadd.f32 %v1265_v45, %v1264_v32 }
 0x409   : > { %v968_v63 = vadd.f32 %v1266_v48, %v1192_v44  ;;  %v1267_v34 = vpop.f32.mrf.mxu1 }
 0x40b   : > { %1006 = vst [vmem:[%s2127_s21] sm:$0xff] %v968_v63  ;;  %v1268_v49 = vpop.f32.mrf.mxu1 }
 0x40c   : > { %v1269_v43 = vadd.f32 %v1268_v49, %v1267_v34 }
 0x40d   : > { %v1270_v22 = vpop.f32.mrf.mxu1 }
 0x40e   : > { %v973_v50 = vadd.f32 %v1269_v43, %v1192_v44 }
 0x40f   : > { %v1271_v53 = vpop.f32.mrf.mxu1 }
 0x410   : > { %1007 = vst [vmem:[%s2127_s21 + $0x8] sm:$0xff] %v973_v50  ;;  %v1272_v54 = vadd.f32 %v1271_v53, %v1270_v22 }
 0x411   : > { %v1273_v30 = vpop.f32.mrf.mxu1 }
 0x412   : > { %v978_v25 = vadd.f32 %v1272_v54, %v1192_v44 }
 0x413   : > { %v1274_v56 = vpop.f32.mrf.mxu1 }
 0x414   : > { %1008 = vst [vmem:[%s2127_s21 + $0x10] sm:$0xff] %v978_v25  ;;  %v1275_v52 = vadd.f32 %v1274_v56, %v1273_v30 }
 0x415   : > { %v1276_v57 = vpop.f32.mrf.mxu1 }
 0x416   : > { %v983_v59 = vadd.f32 %v1275_v52, %v1192_v44 }
 0x417   : > { %v1277_v61 = vpop.f32.mrf.mxu1 }
 0x418   : > { %1009 = vst [vmem:[%s2127_s21 + $0x18] sm:$0xff] %v983_v59  ;;  %v1278_v62 = vadd.f32 %v1277_v61, %v1276_v57 }
 0x419   : > { %v1279_v0 = vpop.f32.mrf.mxu1 }
 0x41a   : > { %v988_v1 = vadd.f32 %v1278_v62, %v1192_v44 }
 0x41b   : > { %v1280_v2 = vpop.f32.mrf.mxu1 }
 0x41c   : > { %1010 = vst [vmem:[%s2127_s21 + $0x20] sm:$0xff] %v988_v1  ;;  %v1281_v4 = vadd.f32 %v1280_v2, %v1279_v0 }
 0x41d   : > { %v1282_v5 = vpop.f32.mrf.mxu1 }
 0x41e   : > { %v993_v7 = vadd.f32 %v1281_v4, %v1192_v44 }
 0x41f   : > { %v1283_v18 = vpop.f32.mrf.mxu1 }
 0x420   : > { %1011 = vst [vmem:[%s2127_s21 + $0x28] sm:$0xff] %v993_v7  ;;  %v1284_v19 = vadd.f32 %v1283_v18, %v1282_v5 }
 0x421   : > { %v1285_v55 = vpop.f32.mrf.mxu1 }
 0x422   : > { %v998_v3 = vadd.f32 %v1284_v19, %v1192_v44 }
 0x423   : > { %v1286_v6 = vpop.f32.mrf.mxu1 }
 0x424   : > { %1012 = vst [vmem:[%s2127_s21 + $0x30] sm:$0xff] %v998_v3  ;;  %v1287_v10 = vadd.f32 %v1286_v6, %v1285_v55 }
 0x426   : > { %v1003_v8 = vadd.f32 %v1287_v10, %v1192_v44 }
 0x428   : > { %1013 = vst [vmem:[%s2127_s21 + $0x38] sm:$0xff] %v1003_v8 }
 0x429   : > { %1571 = shalt.err (!%p1568_p2)
}
 0x42a   : > { %s1572_s7 = scalar_lea.hbm %s2144_s17, 1024  ;;  %s1576_s8 = scalar_lea.hbm %s2245_s26, 8192 }
 0x42b   : > { %p1573_p6 = scmp.ne.s32.totalorder %s2144_s17, %s1572_s7  ;;  %p1577_p11 = scmp.lt.s32.totalorder %s2144_s17, %s2245_s26 }
 0x42c   : > { %p1578_p10 = scmp.lt.s32.totalorder %s1576_s8, %s1572_s7 }
 0x42d   : > { %p1574_p7 = pnand %p1573_p6, %p1809_p12 }
 0x42e   : > { %p1579_p1 = por %p1578_p10, %p1577_p11 }
 0x42f   : > { %p1575_p9 = pneg %p1574_p7 }
 0x431   : > { %p1580_p4 = pnand %p1579_p1, %p1575_p9 }
 0x433   : > { %1583 = shalt.err (!%p1580_p4)
}
 0x434   : > { %s1670_s23 = smov 128   ;;  %s1671_s30 = smov 8  }
 0x435   : > { %1354 = dma.vmem_to_hbm [thread:$0]  (%p1809_p12), %s2138_s20, 1024, %s2144_s17, %s1015_s24, %s1670_s23, %s1670_s23, %s1671_s30  }
 0x436 PF: > { %s2246_s13 = sld [smem:[#allocation13_spill]]  ;;  %p1374_p8 = scmp.ge.s32.totalorder %s1662_s16, 2 }
 0x437   : > { %s2247_s19 = sld [smem:[#allocation16_spill]] }
 0x43c   : > { %s1045_s25 = sand.u32 1, %s2246_s13  }
 0x43d   : > { %p2248_p3 = scmp.ne.s32.totalorder %s2247_s19, 0  ;;  %s1046_s12 = scalar_lea.sflag [#allocation4], %s1045_s25 }
 0x43f   : > { %p1368_p5 = pnand %p1374_p8, %p2248_p3 }
 0x441   : > { %p1369_p13 = pneg %p1368_p5 }
 0x443   : > { %1629 = dma.done.wait (%p1369_p13), %s1046_s12, 1024  }
 0x444   : > { %1631 = vsyncadd (%p1369_p13), %s1046_s12, 4294966272  ;;  %s28_s16 = sadd.s32 1, %s1662_s16   ;;  %s2249_s13 = sld [smem:[#allocation15_spill]] }
 0x445   : > { %p25_p0 = scmp.ge.s32.totalorder %s28_s16, 10   ;;  %s2250_s9 = sld [smem:[#allocation17_spill]] }
 0x446   : > { %s2251_s15 = sld [smem:[#allocation19_spill]]  ;;  %s2252_s30 = smov %s1638_s10 }
 0x447   : > { %s2253_s10 = smov %s1642_s11  ;;  %s2254_s11 = smov %s1829_s27 }
 0x448   : > { %s2255_s12 = smov %s1654_s14  ;;  %27 = sbr.rel (!%p25_p0) target bundleno = 14 (0xe), region = 121 }
 0x44b   : > { %s2256_s14 = smov %s2250_s9 }
 0x44d   :  { %1051 = vsyncpa [#allocation3], 1 }
 0x44e   :  { %1053 = vsyncpa [#allocation3 + $0x1], 1 }
 0x44f   :  { %1054 = vsyncpa [#allocation6], 1 }
 0x450   :  { %1056 = vsyncpa [#allocation6 + $0x1], 1 }
 0x451   :  { %1057 = vsyncpa [#allocation4], 1 }
 0x452   :  { %1059 = vsyncpa [#allocation4 + $0x1], 1 }

</bundles_post_ra>
